<compile_context>
chip_gen: v7x
topology: tpu7x:2x2x1
jax: 0.10.0
libtpu: 0.0.40
codegen_flags: <defaults>
</compile_context>

<pallas_src>
import functools

import jax
import jax.numpy as jnp
from jax import lax
from jax.experimental import pallas as pl
from jax.experimental.pallas import tpu as pltpu


def _round_up(v, m):
    return ((v + m - 1) // m) * m


def _hgcn_kernel(hg_ref, x_ref, out_ref, cur_ref, *opt_scratch,
                 tm, inv, num_layers, hg_resident):
    """Grid = (num_layers + 1, row_tiles); both axes sequential ("arbitrary").

    hg_ref : (tm, Np)    bf16  HG row tile i (streamed; stashed at l == 0 if resident)
    x_ref  : (tm, Dp)    f32   initial embedding tile i (contents only used at l == 0)
    out_ref: (Np, Dp)    f32   resident sum over layers; written to HBM once at end
    cur_ref: (2, Np, Dp) bf16  ping-pong layer state
    opt    : [hgv (Np, Np) bf16] VMEM-resident HG copy when hg_resident
    """
    hgv_ref = opt_scratch[0] if hg_resident else None

    l = pl.program_id(0)
    i = pl.program_id(1)
    i0 = pl.multiple_of(i * tm, tm)
    rows = pl.ds(i0, tm)

    # ---------------- layer 0: init pass (no matmul) -------------------------
    @pl.when(l == 0)
    def _():
        x_tile = x_ref[...]                                   # (tm, Dp) f32
        cur_ref[0, rows, :] = x_tile.astype(cur_ref.dtype)    # layer-0 state
        out_ref[rows, :] = x_tile                             # running sum = x
        if hg_resident:
            hgv_ref[rows, :] = hg_ref[...]                    # stash, off the matmul path

    # ---------------- layers 1..L: one row-tile matmul per grid step ---------
    def layer_step(src_slot, dst_slot):
        if hg_resident:
            hg_tile = hgv_ref[rows, :]          # layers >= 1 never re-read HG from HBM
        else:
            hg_tile = hg_ref[...]               # streamed (tm, Np) bf16 tile
        new_rows = jnp.dot(hg_tile, cur_ref[src_slot],
                           preferred_element_type=jnp.float32)
        cur_ref[dst_slot, rows, :] = new_rows.astype(cur_ref.dtype)
        acc = out_ref[rows, :] + new_rows

        @pl.when(l == num_layers)               # final layer: fold in 1/(L+1)
        def _():
            out_ref[rows, :] = acc * inv

        @pl.when(l < num_layers)
        def _():
            out_ref[rows, :] = acc

    parity = lax.rem(l, 2)

    @pl.when((l > 0) & (parity == 1))
    def _():
        layer_step(0, 1)

    @pl.when((l > 0) & (parity == 0))
    def _():
        layer_step(1, 0)


def hypergraph_conv_forward(x, hg, *, num_layers, tm=None):
    """mean([x, HG x, HG^2 x, ..., HG^L x]) with L = num_layers."""
    n, d = x.shape
    assert hg.shape == (n, n)
    if num_layers <= 0:
        return x                                 # mean of [x] is x

    d_pad = _round_up(max(d, 128), 128)
    n_pad = _round_up(max(n, 128), 128)
    if tm is None:
        tm = next(c for c in (512, 256, 128) if n_pad % c == 0)
    n_pad = _round_up(n_pad, tm)
    ni = n_pad // tm

    x_p = jnp.pad(x.astype(jnp.float32), ((0, n_pad - n), (0, d_pad - d)))
    # TODO(synk): int8 (v5e) / fp8 (v7x) HG representations would halve the
    # dominant HBM stream / double the residency range; bf16 keeps this portable.
    hg_bf = jnp.pad(hg, ((0, n_pad - n), (0, n_pad - n))).astype(jnp.bfloat16)

    # ---------------- per-generation VMEM budgeting --------------------------
    try:
        vmem_cap = int(pltpu.get_tpu_info().vmem_capacity_bytes)
    except Exception:
        vmem_cap = 64 * 2 ** 20                  # conservative (v7x-sized) fallback

    common = (2 * tm * d_pad * 4                 # x tile, double-buffered (f32)
              + 2 * n_pad * d_pad * 4            # resident out block (2x: conservative)
              + 2 * n_pad * d_pad * 2            # cur ping-pong scratch (bf16)
              + 2 * tm * d_pad * 4               # dot-output staging headroom
              + (2 << 20))                       # Mosaic internal scratch headroom
    resident_need = common + 2 * tm * n_pad * 2 + n_pad * n_pad * 2
    hg_resident = resident_need <= int(0.7 * vmem_cap)

    hg_block = (tm, n_pad)
    if hg_resident:
        # Stream real tiles only during the init pass; pinned afterwards so HG
        # is never re-read from HBM once the resident copy exists.
        hg_map = lambda l, i: (jnp.where(l == 0, i, 0), 0)
        hg_spec = pl.BlockSpec(hg_block, hg_map)
        hg_bufs = 2
        need = resident_need
    else:
        # Pinned during init; streamed tile-per-row-tile every matmul layer.
        hg_map = lambda l, i: (jnp.where(l == 0, 0, i), 0)
        hg_spec = pl.BlockSpec(hg_block, hg_map)
        hg_bufs = 2
        if hasattr(pl, "Buffered"):
            try:
                hg_spec = pl.BlockSpec(hg_block, hg_map,
                                       pipeline_mode=pl.Buffered(3))
                hg_bufs = 3
            except TypeError:
                pass
        need = common + hg_bufs * tm * n_pad * 2
    vmem_limit = int(min(0.92 * vmem_cap, max(1.25 * need, 32 * 2 ** 20)))

    scratch = [pltpu.VMEM((2, n_pad, d_pad), jnp.bfloat16)]    # cur ping-pong
    if hg_resident:
        scratch.append(pltpu.VMEM((n_pad, n_pad), jnp.bfloat16))

    kernel = functools.partial(
        _hgcn_kernel, tm=tm, inv=1.0 / float(num_layers + 1),
        num_layers=num_layers, hg_resident=hg_resident)

    cost = pl.CostEstimate(
        flops=2 * num_layers * n_pad * n_pad * d_pad,
        transcendentals=0,
        bytes_accessed=(n_pad * n_pad * 2 * (1 if hg_resident else num_layers)
                        + n_pad * d_pad * 4        # x read
                        + n_pad * d_pad * 4),      # single output writeback
    )

    out_p = pl.pallas_call(
        kernel,
        out_shape=jax.ShapeDtypeStruct((n_pad, d_pad), jnp.float32),
        grid_spec=pltpu.PrefetchScalarGridSpec(
            num_scalar_prefetch=0,
            grid=(num_layers + 1, ni),
            in_specs=[
                hg_spec,                                                     # HG (bf16)
                pl.BlockSpec((tm, d_pad),
                             lambda l, i: (jnp.where(l == 0, i, 0), 0)),     # x (f32)
            ],
            out_specs=pl.BlockSpec((n_pad, d_pad), lambda l, i: (0, 0)),     # resident
            scratch_shapes=scratch,
        ),
        compiler_params=pltpu.CompilerParams(
            # TODO(synk): on v7x the row axis could use both TensorCores via
            # pl.core_map + VMEM_SHARED state with a core_barrier per layer;
            # with a plain grid the shared cur/out scratch forces sequential.
            dimension_semantics=("arbitrary", "arbitrary"),
            vmem_limit_bytes=vmem_limit,
        ),
        cost_estimate=cost,
    )(hg_bf, x_p)

    return out_p[:n, :d].astype(x.dtype)


def _reference_f32(x, hg, num_layers):
    embs = [x]
    cur = x
    for _ in range(num_layers):
        cur = hg @ cur
        embs.append(cur)
    return jnp.mean(jnp.stack(embs), axis=0)


def _reference_mixed(x, hg, num_layers):
    # Mimics the kernel's precision: bf16 MXU operands, f32 accumulation,
    # bf16 layer-to-layer state, f32 running sum.
    hg_bf = hg.astype(jnp.bfloat16)
    acc = x.astype(jnp.float32)
    cur = x.astype(jnp.bfloat16)
    for _ in range(num_layers):
        nxt = jnp.dot(hg_bf, cur, preferred_element_type=jnp.float32)
        acc = acc + nxt
        cur = nxt.astype(jnp.bfloat16)
    return acc / (num_layers + 1)


if __name__ == "__main__":
    key = jax.random.PRNGKey(0)
    k_x, k_hg = jax.random.split(key)

    num_items = 256     # nodes
    emb_dim = 32        # embedding dim (padded to 128 inside the wrapper)
    num_layers = 3      # propagation layers

    x = jax.random.normal(k_x, (num_items, emb_dim), dtype=jnp.float32)
    # Dense "hypergraph" propagation matrix, row-normalized so repeated
    # propagation stays well-scaled.
    hg_raw = jnp.abs(jax.random.normal(k_hg, (num_items, num_items), dtype=jnp.float32))
    hg = hg_raw / jnp.sum(hg_raw, axis=1, keepdims=True)

    out = jax.block_until_ready(hypergraph_conv_forward(x, hg, num_layers=num_layers))
    assert out.shape == (num_items, emb_dim)

    ref_mixed = _reference_mixed(x, hg, num_layers)   # same precision as kernel
    ref_f32 = _reference_f32(x, hg, num_layers)       # exact module semantics
    assert jnp.allclose(out, ref_mixed, atol=5e-3, rtol=5e-3), (
        float(jnp.max(jnp.abs(out - ref_mixed))))
    assert jnp.allclose(out, ref_f32, atol=2e-2, rtol=2e-2), (
        float(jnp.max(jnp.abs(out - ref_f32))))

    print("KERNEL_OK")
</pallas_src>

<mosaic_0001>
module attributes {stable_mosaic.version = 11 : i64} {
  func.func @_hgcn_kernel(%arg0: i32, %arg1: i32, %arg2: memref<256x256xbf16, #tpu.memory_space<vmem>>, %arg3: memref<256x128xf32, #tpu.memory_space<vmem>>, %arg4: memref<256x128xf32, #tpu.memory_space<vmem>>, %arg5: memref<2x256x128xbf16, #tpu.memory_space<vmem>>, %arg6: memref<256x256xbf16, #tpu.memory_space<vmem>>) attributes {dimension_semantics = [#tpu.dimension_semantics<arbitrary>, #tpu.dimension_semantics<arbitrary>], iteration_bounds = array<i64: 4, 1>, scalar_prefetch = 0 : i64, scratch_operands = 2 : i64, tpu.core_type = #tpu.core_type<tc>, window_params = [{transform_indices = @transform_0, window_bounds = array<i64: 256, 256>}, {transform_indices = @transform_1, window_bounds = array<i64: 256, 128>}, {pipeline_mode = #tpu.pipeline_mode<synchronous>, transform_indices = @transform_2, window_bounds = array<i64: 256, 128>}]} {
    %c256_i32 = arith.constant 256 : i32
    %0 = arith.muli %arg1, %c256_i32 : i32
    %1 = tpu.assume_multiple %0, 256 : i32
    %c0_i32 = arith.constant 0 : i32
    %2 = arith.cmpi eq, %arg0, %c0_i32 : i32
    %3 = arith.extui %2 : i1 to i32
    %c0_i32_0 = arith.constant 0 : i32
    %4 = arith.cmpi ne, %3, %c0_i32_0 : i32
    scf.if %4 {
      %c0 = arith.constant 0 : index
      %c0_6 = arith.constant 0 : index
      %16 = vector.load %arg3[%c0, %c0_6] : memref<256x128xf32, #tpu.memory_space<vmem>>, vector<256x128xf32>
      %17 = arith.truncf %16 : vector<256x128xf32> to vector<256x128xbf16>
      %c0_7 = arith.constant 0 : index
      %18 = arith.index_cast %1 : i32 to index
      %c0_8 = arith.constant 0 : index
      %19 = vector.load %arg5[%c0_7, %18, %c0_8] : memref<2x256x128xbf16, #tpu.memory_space<vmem>>, vector<1x256x128xbf16>
      %20 = vector.shape_cast %19 : vector<1x256x128xbf16> to vector<256x128xbf16>
      %21 = vector.shape_cast %17 : vector<256x128xbf16> to vector<1x256x128xbf16>
      tpu.vector_store %arg5[%c0_7, %18, %c0_8], %21 {strides = array<i32>} : memref<2x256x128xbf16, #tpu.memory_space<vmem>>, vector<1x256x128xbf16>,
      %22 = arith.index_cast %1 : i32 to index
      %c0_9 = arith.constant 0 : index
      %23 = vector.load %arg4[%22, %c0_9] : memref<256x128xf32, #tpu.memory_space<vmem>>, vector<256x128xf32>
      tpu.vector_store %arg4[%22, %c0_9], %16 {strides = array<i32>} : memref<256x128xf32, #tpu.memory_space<vmem>>, vector<256x128xf32>,
      %c0_10 = arith.constant 0 : index
      %c0_11 = arith.constant 0 : index
      %24 = vector.load %arg2[%c0_10, %c0_11] : memref<256x256xbf16, #tpu.memory_space<vmem>>, vector<256x256xbf16>
      %25 = arith.index_cast %1 : i32 to index
      %c0_12 = arith.constant 0 : index
      %26 = vector.load %arg6[%25, %c0_12] : memref<256x256xbf16, #tpu.memory_space<vmem>>, vector<256x256xbf16>
      tpu.vector_store %arg6[%25, %c0_12], %24 {strides = array<i32>} : memref<256x256xbf16, #tpu.memory_space<vmem>>, vector<256x256xbf16>,
    } else {
    }
    %c2_i32 = arith.constant 2 : i32
    %5 = arith.remsi %arg0, %c2_i32 : i32
    %c0_i32_1 = arith.constant 0 : i32
    %6 = arith.cmpi sgt, %arg0, %c0_i32_1 : i32
    %c1_i32 = arith.constant 1 : i32
    %7 = arith.cmpi eq, %5, %c1_i32 : i32
    %8 = arith.andi %6, %7 : i1
    %9 = arith.extui %8 : i1 to i32
    %c0_i32_2 = arith.constant 0 : i32
    %10 = arith.cmpi ne, %9, %c0_i32_2 : i32
    scf.if %10 {
      %16 = arith.index_cast %1 : i32 to index
      %c0 = arith.constant 0 : index
      %17 = vector.load %arg6[%16, %c0] : memref<256x256xbf16, #tpu.memory_space<vmem>>, vector<256x256xbf16>
      %c0_6 = arith.constant 0 : index
      %c0_7 = arith.constant 0 : index
      %c0_8 = arith.constant 0 : index
      %18 = vector.load %arg5[%c0_6, %c0_7, %c0_8] : memref<2x256x128xbf16, #tpu.memory_space<vmem>>, vector<1x256x128xbf16>
      %19 = vector.shape_cast %18 : vector<1x256x128xbf16> to vector<256x128xbf16>
      %cst = arith.constant dense<0.000000e+00> : vector<256x128xf32>
      %20 = tpu.matmul %17, %19, %cst {dimension_numbers = #tpu.dot_dimension_numbers<[1], [0], [0], [1], [0, 0, 1, 1], [], []>} : vector<256x256xbf16>, vector<256x128xbf16>, vector<256x128xf32> -> vector<256x128xf32>
      %21 = arith.truncf %20 : vector<256x128xf32> to vector<256x128xbf16>
      %c1 = arith.constant 1 : index
      %22 = arith.index_cast %1 : i32 to index
      %c0_9 = arith.constant 0 : index
      %23 = vector.load %arg5[%c1, %22, %c0_9] : memref<2x256x128xbf16, #tpu.memory_space<vmem>>, vector<1x256x128xbf16>
      %24 = vector.shape_cast %23 : vector<1x256x128xbf16> to vector<256x128xbf16>
      %25 = vector.shape_cast %21 : vector<256x128xbf16> to vector<1x256x128xbf16>
      tpu.vector_store %arg5[%c1, %22, %c0_9], %25 {strides = array<i32>} : memref<2x256x128xbf16, #tpu.memory_space<vmem>>, vector<1x256x128xbf16>,
      %26 = arith.index_cast %1 : i32 to index
      %c0_10 = arith.constant 0 : index
      %27 = vector.load %arg4[%26, %c0_10] : memref<256x128xf32, #tpu.memory_space<vmem>>, vector<256x128xf32>
      %28 = arith.addf %27, %20 : vector<256x128xf32>
      %c3_i32 = arith.constant 3 : i32
      %29 = arith.cmpi eq, %arg0, %c3_i32 : i32
      %30 = arith.extui %29 : i1 to i32
      %c0_i32_11 = arith.constant 0 : i32
      %31 = arith.cmpi ne, %30, %c0_i32_11 : i32
      scf.if %31 {
        %cst_14 = arith.constant 2.500000e-01 : f32
        %35 = vector.broadcast %cst_14 : f32 to vector<256x128xf32>
        %36 = arith.mulf %28, %35 : vector<256x128xf32>
        %37 = arith.index_cast %1 : i32 to index
        %c0_15 = arith.constant 0 : index
        %38 = vector.load %arg4[%37, %c0_15] : memref<256x128xf32, #tpu.memory_space<vmem>>, vector<256x128xf32>
        tpu.vector_store %arg4[%37, %c0_15], %36 {strides = array<i32>} : memref<256x128xf32, #tpu.memory_space<vmem>>, vector<256x128xf32>,
      } else {
      }
      %c3_i32_12 = arith.constant 3 : i32
      %32 = arith.cmpi slt, %arg0, %c3_i32_12 : i32
      %33 = arith.extui %32 : i1 to i32
      %c0_i32_13 = arith.constant 0 : i32
      %34 = arith.cmpi ne, %33, %c0_i32_13 : i32
      scf.if %34 {
        %35 = arith.index_cast %1 : i32 to index
        %c0_14 = arith.constant 0 : index
        %36 = vector.load %arg4[%35, %c0_14] : memref<256x128xf32, #tpu.memory_space<vmem>>, vector<256x128xf32>
        tpu.vector_store %arg4[%35, %c0_14], %28 {strides = array<i32>} : memref<256x128xf32, #tpu.memory_space<vmem>>, vector<256x128xf32>,
      } else {
      }
    } else {
    }
    %c0_i32_3 = arith.constant 0 : i32
    %11 = arith.cmpi sgt, %arg0, %c0_i32_3 : i32
    %c0_i32_4 = arith.constant 0 : i32
    %12 = arith.cmpi eq, %5, %c0_i32_4 : i32
    %13 = arith.andi %11, %12 : i1
    %14 = arith.extui %13 : i1 to i32
    %c0_i32_5 = arith.constant 0 : i32
    %15 = arith.cmpi ne, %14, %c0_i32_5 : i32
    scf.if %15 {
      %16 = arith.index_cast %1 : i32 to index
      %c0 = arith.constant 0 : index
      %17 = vector.load %arg6[%16, %c0] : memref<256x256xbf16, #tpu.memory_space<vmem>>, vector<256x256xbf16>
      %c1 = arith.constant 1 : index
      %c0_6 = arith.constant 0 : index
      %c0_7 = arith.constant 0 : index
      %18 = vector.load %arg5[%c1, %c0_6, %c0_7] : memref<2x256x128xbf16, #tpu.memory_space<vmem>>, vector<1x256x128xbf16>
      %19 = vector.shape_cast %18 : vector<1x256x128xbf16> to vector<256x128xbf16>
      %cst = arith.constant dense<0.000000e+00> : vector<256x128xf32>
      %20 = tpu.matmul %17, %19, %cst {dimension_numbers = #tpu.dot_dimension_numbers<[1], [0], [0], [1], [0, 0, 1, 1], [], []>} : vector<256x256xbf16>, vector<256x128xbf16>, vector<256x128xf32> -> vector<256x128xf32>
      %21 = arith.truncf %20 : vector<256x128xf32> to vector<256x128xbf16>
      %c0_8 = arith.constant 0 : index
      %22 = arith.index_cast %1 : i32 to index
      %c0_9 = arith.constant 0 : index
      %23 = vector.load %arg5[%c0_8, %22, %c0_9] : memref<2x256x128xbf16, #tpu.memory_space<vmem>>, vector<1x256x128xbf16>
      %24 = vector.shape_cast %23 : vector<1x256x128xbf16> to vector<256x128xbf16>
      %25 = vector.shape_cast %21 : vector<256x128xbf16> to vector<1x256x128xbf16>
      tpu.vector_store %arg5[%c0_8, %22, %c0_9], %25 {strides = array<i32>} : memref<2x256x128xbf16, #tpu.memory_space<vmem>>, vector<1x256x128xbf16>,
      %26 = arith.index_cast %1 : i32 to index
      %c0_10 = arith.constant 0 : index
      %27 = vector.load %arg4[%26, %c0_10] : memref<256x128xf32, #tpu.memory_space<vmem>>, vector<256x128xf32>
      %28 = arith.addf %27, %20 : vector<256x128xf32>
      %c3_i32 = arith.constant 3 : i32
      %29 = arith.cmpi eq, %arg0, %c3_i32 : i32
      %30 = arith.extui %29 : i1 to i32
      %c0_i32_11 = arith.constant 0 : i32
      %31 = arith.cmpi ne, %30, %c0_i32_11 : i32
      scf.if %31 {
        %cst_14 = arith.constant 2.500000e-01 : f32
        %35 = vector.broadcast %cst_14 : f32 to vector<256x128xf32>
        %36 = arith.mulf %28, %35 : vector<256x128xf32>
        %37 = arith.index_cast %1 : i32 to index
        %c0_15 = arith.constant 0 : index
        %38 = vector.load %arg4[%37, %c0_15] : memref<256x128xf32, #tpu.memory_space<vmem>>, vector<256x128xf32>
        tpu.vector_store %arg4[%37, %c0_15], %36 {strides = array<i32>} : memref<256x128xf32, #tpu.memory_space<vmem>>, vector<256x128xf32>,
      } else {
      }
      %c3_i32_12 = arith.constant 3 : i32
      %32 = arith.cmpi slt, %arg0, %c3_i32_12 : i32
      %33 = arith.extui %32 : i1 to i32
      %c0_i32_13 = arith.constant 0 : i32
      %34 = arith.cmpi ne, %33, %c0_i32_13 : i32
      scf.if %34 {
        %35 = arith.index_cast %1 : i32 to index
        %c0_14 = arith.constant 0 : index
        %36 = vector.load %arg4[%35, %c0_14] : memref<256x128xf32, #tpu.memory_space<vmem>>, vector<256x128xf32>
        tpu.vector_store %arg4[%35, %c0_14], %28 {strides = array<i32>} : memref<256x128xf32, #tpu.memory_space<vmem>>, vector<256x128xf32>,
      } else {
      }
    } else {
    }
    return
  }
  func.func @transform_0(%arg0: i32, %arg1: i32) -> (i32, i32) {
    %c0_i32 = arith.constant 0 : i32
    %0 = arith.cmpi eq, %arg0, %c0_i32 : i32
    %c0_i32_0 = arith.constant 0 : i32
    %1 = arith.select %0, %arg1, %c0_i32_0 : i32
    %c0_i32_1 = arith.constant 0 : i32
    %c0_i32_2 = arith.constant 0 : i32
    return %1, %c0_i32_1 : i32, i32
  }
  func.func @transform_1(%arg0: i32, %arg1: i32) -> (i32, i32) {
    %c0_i32 = arith.constant 0 : i32
    %0 = arith.cmpi eq, %arg0, %c0_i32 : i32
    %c0_i32_0 = arith.constant 0 : i32
    %1 = arith.select %0, %arg1, %c0_i32_0 : i32
    %c0_i32_1 = arith.constant 0 : i32
    %c0_i32_2 = arith.constant 0 : i32
    return %1, %c0_i32_1 : i32, i32
  }
  func.func @transform_2(%arg0: i32, %arg1: i32) -> (i32, i32) {
    %c0_i32 = arith.constant 0 : i32
    %c0_i32_0 = arith.constant 0 : i32
    %c0_i32_1 = arith.constant 0 : i32
    return %c0_i32, %c0_i32_0 : i32, i32
  }
}

</mosaic_0001>

<bundles_post_ra>
// kernel: tpu_custom_call.1
= control target key start
LH: loop header
LB: loop body
LE: loop exit
PB: predicated region body
PF: predicated region fallthrough
CT: control target
= control target key end

     0   :  { %7 = vsyncpa [#allocation5], 0  ;;  %s2476_s0 = inlined_call_operand.hbm [shape: bf16[256,256], index: 0, kind: input, shape index: {}]   ;;  %s2477_s1 = inlined_call_operand.hbm [shape: f32[256,128], index: 1, kind: input, shape index: {}]   ;;  %s2478_s2 = inlined_call_operand.hbm [shape: f32[256,128], index: 2, kind: output, shape index: {}]  }
   0x1   :  { %9 = vsyncpa [#allocation5 + $0x1], 0 }
   0x2   :  { %10 = vsyncpa [#allocation8], 0 }
   0x3   :  { %12 = vsyncpa [#allocation8 + $0x1], 0 }
   0x4   :  { %13 = vsyncpa [#allocation6], 0  ;;  %s2085_s9 = smov 0   ;;  %s2087_s10 = smov 0  }
   0x5   :  { %s2089_s11 = smov 0  }
   0x6 LB: > { %s1518_s12 = sadd.s32 4294967295, %s2061_s11   ;;  %s31_s13 = sadd.s32 1, %s2057_s10  ;;  %s2061_s11 = sphi %s2089_s11, %s19_s11   ;;  %s2057_s10 = sphi %s2087_s10, %s2486_s10   ;;  %s2053_s9 = sphi %s2085_s9, %s2485_s9  }
   0x7   : > { %p33_p0 = scmp.ge.s32.totalorder %s31_s13, 4  ;;  %p1859_p1 = scmp.lt.s32.totalorder %s2061_s11, 4 }
   0x8   : > { %p1860_p2 = scmp.eq.s32.totalorder %s2061_s11, 0  ;;  %s2063_s14 = smov [#allocation4]  }
   0x9   : > { %s2488_s13 = smov (%p33_p0, %s31_s13), 0  ;;  %s144_s15 = sshll.u32 %s2063_s14, 4  ;;  %s145_s15 = int_to_ptr.vmem [resolvable:$true] %s144_s15 }
   0xa   : > { %p2106_p3 = pnand %p1860_p2, %p1859_p1  ;;  %s1945_s19 = scalar_lea.hbm %s2476_s0, 4096 }
   0xb   : > { %p1946_p6 = scmp.ne.s32.totalorder %s2476_s0, %s1945_s19  ;;  %p1952_p10 = scmp.lt.u32.totalorder %s1945_s19, %s2476_s0 }
   0xc   : > { %p1947_p7 = pneg %p2106_p3 }
   0xe   : > { %p1948_p8 = pnand %p1947_p7, %p1946_p6 }
  0x10   : > { %p1949_p9 = pneg %p1948_p8 }
  0x12   : > { %p1954_p11 = pnand %p1952_p10, %p1949_p9 }
  0x14   : > { %1957 = shalt.err (!%p1954_p11)
}
  0x15   : > { %s1958_s24 = scalar_lea.vmem %s145_s15, 4096  ;;  %s1965_s25 = scalar_lea.vmem %s145_s15, 8192 }
  0x16   : > { %p1959_p12 = scmp.ne.s32.totalorder %s145_s15, %s1958_s24  ;;  %p1966_p1 = scmp.lt.s32.totalorder %s145_s15, %s145_s15 }
  0x17   : > { %p1967_p2 = scmp.lt.s32.totalorder %s1965_s25, %s1958_s24 }
  0x18   : > { %p1961_p13 = pnand %p1959_p12, %p1947_p7 }
  0x19   : > { %p1968_p4 = por %p1967_p2, %p1966_p1 }
  0x1a   : > { %p1962_p0 = pneg %p1961_p13 }
  0x1c   : > { %p1969_p5 = pnand %p1968_p4, %p1962_p0 }
  0x1e   : > { %1972 = shalt.err (!%p1969_p5)
}
  0x1f   : > { %s2064_s26 = smov 128   ;;  %s2065_s27 = smov 8  }
  0x20   : > { %1855 = dma.hbm_to_vmem [thread:$0]  (!%p2106_p3), %s2476_s0, 4096, %s145_s15, [#allocation5], %s2064_s26, %s2064_s26, %s2065_s27  }
  0x21   : > { %p2480_p6 = scmp.lt.s32.totalorder %s2061_s11, 5  ;;  %p2481_p8 = scmp.ge.s32.totalorder %s2061_s11, 1 }
  0x22   : > { %s2066_s3 = smov [#allocation7]   ;;  %s1973_s7 = scalar_lea.hbm %s2477_s1, 4096 }
  0x23   : > { %p2138_p9 = pnand %p2481_p8, %p2480_p6  ;;  %s167_s4 = sshll.u32 %s2066_s3, 4  ;;  %s168_s4 = int_to_ptr.vmem [resolvable:$true] %s167_s4 }
  0x24   : > { %p1974_p4 = scmp.ne.s32.totalorder %s2477_s1, %s1973_s7  ;;  %p1980_p11 = scmp.lt.u32.totalorder %s1973_s7, %s2477_s1 }
  0x25   : > { %s2482_s30 = scalar_select %p2138_p9, 1, 0 }
  0x26   : > { %p1976_p5 = pnand %p1974_p4, %p1947_p7 }
  0x28   : > { %p1977_p10 = pneg %p1976_p5 }
  0x2a   : > { %p1982_p12 = pnand %p1980_p11, %p1977_p10 }
  0x2c   : > { %1985 = shalt.err (!%p1982_p12)
}
  0x2d   : > { %s1986_s18 = scalar_lea.vmem %s168_s4, 4096  ;;  %s1993_s19 = scalar_lea.vmem %s168_s4, 8192 }
  0x2e   : > { %p1987_p13 = scmp.ne.s32.totalorder %s168_s4, %s1986_s18  ;;  %p1994_p2 = scmp.lt.s32.totalorder %s168_s4, %s168_s4 }
  0x2f   : > { %p1995_p6 = scmp.lt.s32.totalorder %s1993_s19, %s1986_s18 }
  0x30   : > { %p1989_p0 = pnand %p1987_p13, %p1947_p7 }
  0x31   : > { %p1996_p8 = por %p1995_p6, %p1994_p2 }
  0x32   : > { %p1990_p1 = pneg %p1989_p0 }
  0x34   : > { %p1997_p9 = pnand %p1996_p8, %p1990_p1 }
  0x36   : > { %2000 = shalt.err (!%p1997_p9)
}
  0x37   : > { %1858 = dma.hbm_to_vmem [thread:$0]  (!%p2106_p3), %s2477_s1, 4096, %s168_s4, [#allocation8], %s2064_s26, %s2064_s26, %s2065_s27  }
  0x38   : > { %p2483_p4 = scmp.ne.s32.totalorder %s2482_s30, 0 }
  0x39   : > { %p1862_p5 = scmp.eq.s32.totalorder (!%p2483_p4), %s1518_s12, 0 }
  0x3a   : > { %179 = sbr.rel (%p2483_p4) target bundleno = 817 (0x331), region = 28 }
  0x41   : > { %2040 = dma.done.wait (%p1862_p5), [#allocation5], 4096  }
  0x42   : > { %2042 = vsyncadd (%p1862_p5), [#allocation5], 4294963200 }
  0x43   : > { %2044 = dma.done.wait (%p1862_p5), [#allocation8], 4096  }
  0x44   : > { %2046 = vsyncadd (%p1862_p5), [#allocation8], 4294963200  ;;  %p1526_p7 = scmp.ne.s32.totalorder %s2053_s9, 0 }
  0x45   : > { %v227_v0 = vld [vmem:[#allocation7] sm:$0xff] (!%p1526_p7)  ;;  %v228_v1 = vld [vmem:[#allocation7 + $0x8] sm:$0xff] (!%p1526_p7)  ;;  %v229_v2 = vld [vmem:[#allocation7 + $0x10] sm:$0xff] (!%p1526_p7) }
  0x46   : > { %226 = sbr.rel (%p1526_p7) target bundleno = 110 (0x6e), region = 40  ;;  %v259_v3 = vpack.c.bf16 (!%p1526_p7), %v228_v1, %v227_v0  ;;  %296 = vst [vmem:[#allocation9] sm:$0xff] (!%p1526_p7), %v227_v0  ;;  %297 = vst [vmem:[#allocation9 + $0x8] sm:$0xff] (!%p1526_p7), %v228_v1  ;;  %v230_v4 = vld [vmem:[#allocation7 + $0x18] sm:$0xff] (!%p1526_p7)  ;;  %v231_v5 = vld [vmem:[#allocation7 + $0x20] sm:$0xff] (!%p1526_p7) }
  0x47   : > { %298 = vst [vmem:[#allocation9 + $0x10] sm:$0xff] (!%p1526_p7), %v229_v2  ;;  %v232_v6 = vld [vmem:[#allocation7 + $0x28] sm:$0xff] (!%p1526_p7)  ;;  %v260_v7 = vpack.c.bf16 (!%p1526_p7), %v230_v4, %v229_v2  ;;  %299 = vst [vmem:[#allocation9 + $0x18] sm:$0xff] (!%p1526_p7), %v230_v4  ;;  %v233_v9 = vld [vmem:[#allocation7 + $0x30] sm:$0xff] (!%p1526_p7) }
  0x48   : > { %v261_v8 = vpack.c.bf16 (!%p1526_p7), %v232_v6, %v231_v5  ;;  %300 = vst [vmem:[#allocation9 + $0x20] sm:$0xff] (!%p1526_p7), %v231_v5  ;;  %301 = vst [vmem:[#allocation9 + $0x28] sm:$0xff] (!%p1526_p7), %v232_v6  ;;  %v234_v10 = vld [vmem:[#allocation7 + $0x38] sm:$0xff] (!%p1526_p7)  ;;  %v235_v11 = vld [vmem:[#allocation7 + $0x40] sm:$0xff] (!%p1526_p7) }
  0x49   : > { %279 = vst [vmem:[#allocation2] sm:$0xff] (!%p1526_p7), %v259_v3  ;;  %v262_v12 = vpack.c.bf16 (!%p1526_p7), %v234_v10, %v233_v9  ;;  %302 = vst [vmem:[#allocation9 + $0x30] sm:$0xff] (!%p1526_p7), %v233_v9  ;;  %v236_v13 = vld [vmem:[#allocation7 + $0x48] sm:$0xff] (!%p1526_p7)  ;;  %v237_v14 = vld [vmem:[#allocation7 + $0x50] sm:$0xff] (!%p1526_p7) }
  0x4a   : > { %303 = vst [vmem:[#allocation9 + $0x38] sm:$0xff] (!%p1526_p7), %v234_v10  ;;  %304 = vst [vmem:[#allocation9 + $0x40] sm:$0xff] (!%p1526_p7), %v235_v11  ;;  %v238_v15 = vld [vmem:[#allocation7 + $0x58] sm:$0xff] (!%p1526_p7)  ;;  %v263_v16 = vpack.c.bf16 (!%p1526_p7), %v236_v13, %v235_v11  ;;  %v239_v18 = vld [vmem:[#allocation7 + $0x60] sm:$0xff] (!%p1526_p7) }
  0x4b   : > { %280 = vst [vmem:[#allocation2 + $0x8] sm:$0xff] (!%p1526_p7), %v260_v7  ;;  %281 = vst [vmem:[#allocation2 + $0x10] sm:$0xff] (!%p1526_p7), %v261_v8  ;;  %v264_v17 = vpack.c.bf16 (!%p1526_p7), %v238_v15, %v237_v14  ;;  %v240_v19 = vld [vmem:[#allocation7 + $0x68] sm:$0xff] (!%p1526_p7)  ;;  %v241_v20 = vld [vmem:[#allocation7 + $0x70] sm:$0xff] (!%p1526_p7) }
  0x4c   : > { %305 = vst [vmem:[#allocation9 + $0x48] sm:$0xff] (!%p1526_p7), %v236_v13  ;;  %306 = vst [vmem:[#allocation9 + $0x50] sm:$0xff] (!%p1526_p7), %v237_v14  ;;  %v265_v21 = vpack.c.bf16 (!%p1526_p7), %v240_v19, %v239_v18  ;;  %v242_v22 = vld [vmem:[#allocation7 + $0x78] sm:$0xff] (!%p1526_p7)  ;;  %v243_v23 = vld [vmem:[#allocation7 + $0x80] sm:$0xff] (!%p1526_p7) }
  0x4d   : > { %307 = vst [vmem:[#allocation9 + $0x58] sm:$0xff] %v238_v15  ;;  %282 = vst [vmem:[#allocation2 + $0x18] sm:$0xff] %v262_v12  ;;  %v244_v24 = vld [vmem:[#allocation7 + $0x88] sm:$0xff]  ;;  %v266_v25 = vpack.c.bf16 %v242_v22, %v241_v20  ;;  %v245_v27 = vld [vmem:[#allocation7 + $0x90] sm:$0xff] }
  0x4e   : > { %308 = vst [vmem:[#allocation9 + $0x60] sm:$0xff] %v239_v18  ;;  %309 = vst [vmem:[#allocation9 + $0x68] sm:$0xff] %v240_v19  ;;  %v267_v26 = vpack.c.bf16 %v244_v24, %v243_v23  ;;  %v246_v28 = vld [vmem:[#allocation7 + $0x98] sm:$0xff]  ;;  %v247_v29 = vld [vmem:[#allocation7 + $0xa0] sm:$0xff] }
  0x4f   : > { %310 = vst [vmem:[#allocation9 + $0x70] sm:$0xff] %v241_v20  ;;  %283 = vst [vmem:[#allocation2 + $0x20] sm:$0xff] %v263_v16  ;;  %v268_v30 = vpack.c.bf16 %v246_v28, %v245_v27  ;;  %v248_v31 = vld [vmem:[#allocation7 + $0xa8] sm:$0xff]  ;;  %v249_v32 = vld [vmem:[#allocation7 + $0xb0] sm:$0xff] }
  0x50   : > { %284 = vst [vmem:[#allocation2 + $0x28] sm:$0xff] %v264_v17  ;;  %311 = vst [vmem:[#allocation9 + $0x78] sm:$0xff] %v242_v22  ;;  %v250_v33 = vld [vmem:[#allocation7 + $0xb8] sm:$0xff]  ;;  %v269_v34 = vpack.c.bf16 %v248_v31, %v247_v29  ;;  %v251_v36 = vld [vmem:[#allocation7 + $0xc0] sm:$0xff] }
  0x51   : > { %312 = vst [vmem:[#allocation9 + $0x80] sm:$0xff] %v243_v23  ;;  %313 = vst [vmem:[#allocation9 + $0x88] sm:$0xff] %v244_v24  ;;  %v270_v35 = vpack.c.bf16 %v250_v33, %v249_v32  ;;  %v252_v37 = vld [vmem:[#allocation7 + $0xc8] sm:$0xff]  ;;  %v253_v38 = vld [vmem:[#allocation7 + $0xd0] sm:$0xff] }
  0x52   : > { %285 = vst [vmem:[#allocation2 + $0x30] sm:$0xff] %v265_v21  ;;  %314 = vst [vmem:[#allocation9 + $0x90] sm:$0xff] %v245_v27  ;;  %v271_v39 = vpack.c.bf16 %v252_v37, %v251_v36  ;;  %v254_v40 = vld [vmem:[#allocation7 + $0xd8] sm:$0xff]  ;;  %v255_v41 = vld [vmem:[#allocation7 + $0xe0] sm:$0xff] }
  0x53   : > { %315 = vst [vmem:[#allocation9 + $0x98] sm:$0xff] %v246_v28  ;;  %316 = vst [vmem:[#allocation9 + $0xa0] sm:$0xff] %v247_v29  ;;  %v256_v42 = vld [vmem:[#allocation7 + $0xe8] sm:$0xff]  ;;  %v272_v43 = vpack.c.bf16 %v254_v40, %v253_v38  ;;  %v257_v45 = vld [vmem:[#allocation7 + $0xf0] sm:$0xff] }
  0x54   : > { %286 = vst [vmem:[#allocation2 + $0x38] sm:$0xff] %v266_v25  ;;  %287 = vst [vmem:[#allocation2 + $0x40] sm:$0xff] %v267_v26  ;;  %v273_v44 = vpack.c.bf16 %v256_v42, %v255_v41  ;;  %v258_v46 = vld [vmem:[#allocation7 + $0xf8] sm:$0xff]  ;;  %v1897_v48 = vld [vmem:[#allocation4] ss:$8 sps:$4 sm:$0xff]  }
  0x55   : > { %317 = vst [vmem:[#allocation9 + $0xa8] sm:$0xff] %v248_v31  ;;  %318 = vst [vmem:[#allocation9 + $0xb0] sm:$0xff] %v249_v32  ;;  %v274_v47 = vpack.c.bf16 %v258_v46, %v257_v45  ;;  %v1899_v49 = vld [vmem:[#allocation4 + $0x4] ss:$8 sps:$4 sm:$0xff]   ;;  %v1900_v50 = vld [vmem:[#allocation4 + $0x10] ss:$8 sps:$4 sm:$0xff]  }
  0x56   : > { %319 = vst [vmem:[#allocation9 + $0xb8] sm:$0xff] %v250_v33  ;;  %288 = vst [vmem:[#allocation2 + $0x48] sm:$0xff] %v268_v30  ;;  %v1902_v51 = vld [vmem:[#allocation4 + $0x14] ss:$8 sps:$4 sm:$0xff]   ;;  %v1903_v52 = vld [vmem:[#allocation4 + $0x20] ss:$8 sps:$4 sm:$0xff]  }
  0x57   : > { %320 = vst [vmem:[#allocation9 + $0xc0] sm:$0xff] %v251_v36  ;;  %321 = vst [vmem:[#allocation9 + $0xc8] sm:$0xff] %v252_v37  ;;  %v1905_v53 = vld [vmem:[#allocation4 + $0x24] ss:$8 sps:$4 sm:$0xff]   ;;  %v1906_v54 = vld [vmem:[#allocation4 + $0x30] ss:$8 sps:$4 sm:$0xff]  }
  0x58   : > { %322 = vst [vmem:[#allocation9 + $0xd0] sm:$0xff] %v253_v38  ;;  %289 = vst [vmem:[#allocation2 + $0x50] sm:$0xff] %v269_v34  ;;  %v1908_v55 = vld [vmem:[#allocation4 + $0x34] ss:$8 sps:$4 sm:$0xff]   ;;  %v1909_v56 = vld [vmem:[#allocation4 + $0x40] ss:$8 sps:$4 sm:$0xff]  }
  0x59   : > { %290 = vst [vmem:[#allocation2 + $0x58] sm:$0xff] %v270_v35  ;;  %323 = vst [vmem:[#allocation9 + $0xd8] sm:$0xff] %v254_v40  ;;  %v1911_v57 = vld [vmem:[#allocation4 + $0x44] ss:$8 sps:$4 sm:$0xff]   ;;  %v1912_v58 = vld [vmem:[#allocation4 + $0x50] ss:$8 sps:$4 sm:$0xff]  }
  0x5a   : > { %324 = vst [vmem:[#allocation9 + $0xe0] sm:$0xff] %v255_v41  ;;  %325 = vst [vmem:[#allocation9 + $0xe8] sm:$0xff] %v256_v42  ;;  %v1914_v59 = vld [vmem:[#allocation4 + $0x54] ss:$8 sps:$4 sm:$0xff]   ;;  %v1915_v60 = vld [vmem:[#allocation4 + $0x60] ss:$8 sps:$4 sm:$0xff]  }
  0x5b   : > { %291 = vst [vmem:[#allocation2 + $0x60] sm:$0xff] %v271_v39  ;;  %326 = vst [vmem:[#allocation9 + $0xf0] sm:$0xff] %v257_v45  ;;  %v1917_v61 = vld [vmem:[#allocation4 + $0x64] ss:$8 sps:$4 sm:$0xff]   ;;  %v1918_v62 = vld [vmem:[#allocation4 + $0x70] ss:$8 sps:$4 sm:$0xff]  }
  0x5c   : > { %327 = vst [vmem:[#allocation9 + $0xf8] sm:$0xff] %v258_v46  ;;  %292 = vst [vmem:[#allocation2 + $0x68] sm:$0xff] %v272_v43  ;;  %v1920_v63 = vld [vmem:[#allocation4 + $0x74] ss:$8 sps:$4 sm:$0xff]   ;;  %v1921_v0 = vld [vmem:[#allocation4 + $0x80] ss:$8 sps:$4 sm:$0xff]  }
  0x5d   : > { %293 = vst [vmem:[#allocation2 + $0x70] sm:$0xff] %v273_v44  ;;  %294 = vst [vmem:[#allocation2 + $0x78] sm:$0xff] %v274_v47  ;;  %v1923_v1 = vld [vmem:[#allocation4 + $0x84] ss:$8 sps:$4 sm:$0xff]   ;;  %v1924_v2 = vld [vmem:[#allocation4 + $0x90] ss:$8 sps:$4 sm:$0xff]  }
  0x5e   : > { %523 = vst [vmem:[#allocation3] sm:$0xff] %v1897_v48  ;;  %524 = vst [vmem:[#allocation3 + $0x8] sm:$0xff] %v1899_v49  ;;  %v1926_v3 = vld [vmem:[#allocation4 + $0x94] ss:$8 sps:$4 sm:$0xff]   ;;  %v1927_v4 = vld [vmem:[#allocation4 + $0xa0] ss:$8 sps:$4 sm:$0xff]  }
  0x5f   : > { %525 = vst [vmem:[#allocation3 + $0x10] sm:$0xff] %v1900_v50  ;;  %526 = vst [vmem:[#allocation3 + $0x18] sm:$0xff] %v1902_v51  ;;  %v1929_v5 = vld [vmem:[#allocation4 + $0xa4] ss:$8 sps:$4 sm:$0xff]   ;;  %v1930_v6 = vld [vmem:[#allocation4 + $0xb0] ss:$8 sps:$4 sm:$0xff]  }
  0x60   : > { %527 = vst [vmem:[#allocation3 + $0x20] sm:$0xff] %v1903_v52  ;;  %528 = vst [vmem:[#allocation3 + $0x28] sm:$0xff] %v1905_v53  ;;  %v1932_v7 = vld [vmem:[#allocation4 + $0xb4] ss:$8 sps:$4 sm:$0xff]   ;;  %v1933_v8 = vld [vmem:[#allocation4 + $0xc0] ss:$8 sps:$4 sm:$0xff]  }
  0x61   : > { %529 = vst [vmem:[#allocation3 + $0x30] sm:$0xff] %v1906_v54  ;;  %530 = vst [vmem:[#allocation3 + $0x38] sm:$0xff] %v1908_v55  ;;  %v1935_v9 = vld [vmem:[#allocation4 + $0xc4] ss:$8 sps:$4 sm:$0xff]   ;;  %v1936_v10 = vld [vmem:[#allocation4 + $0xd0] ss:$8 sps:$4 sm:$0xff]  }
  0x62   : > { %531 = vst [vmem:[#allocation3 + $0x40] sm:$0xff] %v1909_v56  ;;  %532 = vst [vmem:[#allocation3 + $0x48] sm:$0xff] %v1911_v57  ;;  %v1938_v11 = vld [vmem:[#allocation4 + $0xd4] ss:$8 sps:$4 sm:$0xff]   ;;  %v1939_v12 = vld [vmem:[#allocation4 + $0xe0] ss:$8 sps:$4 sm:$0xff]  }
  0x63   : > { %533 = vst [vmem:[#allocation3 + $0x50] sm:$0xff] %v1912_v58  ;;  %534 = vst [vmem:[#allocation3 + $0x58] sm:$0xff] %v1914_v59  ;;  %v1941_v13 = vld [vmem:[#allocation4 + $0xe4] ss:$8 sps:$4 sm:$0xff]   ;;  %v1942_v14 = vld [vmem:[#allocation4 + $0xf0] ss:$8 sps:$4 sm:$0xff]  }
  0x64   : > { %535 = vst [vmem:[#allocation3 + $0x60] sm:$0xff] %v1915_v60  ;;  %536 = vst [vmem:[#allocation3 + $0x68] sm:$0xff] %v1917_v61  ;;  %v1944_v15 = vld [vmem:[#allocation4 + $0xf4] ss:$8 sps:$4 sm:$0xff]  }
  0x65   : > { %537 = vst [vmem:[#allocation3 + $0x70] sm:$0xff] %v1918_v62  ;;  %538 = vst [vmem:[#allocation3 + $0x78] sm:$0xff] %v1920_v63 }
  0x66   : > { %539 = vst [vmem:[#allocation3 + $0x80] sm:$0xff] %v1921_v0  ;;  %540 = vst [vmem:[#allocation3 + $0x88] sm:$0xff] %v1923_v1 }
  0x67   : > { %541 = vst [vmem:[#allocation3 + $0x90] sm:$0xff] %v1924_v2  ;;  %542 = vst [vmem:[#allocation3 + $0x98] sm:$0xff] %v1926_v3 }
  0x68   : > { %543 = vst [vmem:[#allocation3 + $0xa0] sm:$0xff] %v1927_v4  ;;  %544 = vst [vmem:[#allocation3 + $0xa8] sm:$0xff] %v1929_v5 }
  0x69   : > { %545 = vst [vmem:[#allocation3 + $0xb0] sm:$0xff] %v1930_v6  ;;  %546 = vst [vmem:[#allocation3 + $0xb8] sm:$0xff] %v1932_v7 }
  0x6a   : > { %547 = vst [vmem:[#allocation3 + $0xc0] sm:$0xff] %v1933_v8  ;;  %548 = vst [vmem:[#allocation3 + $0xc8] sm:$0xff] %v1935_v9 }
  0x6b   : > { %549 = vst [vmem:[#allocation3 + $0xd0] sm:$0xff] %v1936_v10  ;;  %550 = vst [vmem:[#allocation3 + $0xd8] sm:$0xff] %v1938_v11 }
  0x6c   : > { %551 = vst [vmem:[#allocation3 + $0xe0] sm:$0xff] %v1939_v12  ;;  %552 = vst [vmem:[#allocation3 + $0xe8] sm:$0xff] %v1941_v13 }
  0x6d   : > { %553 = vst [vmem:[#allocation3 + $0xf0] sm:$0xff] %v1942_v14  ;;  %554 = vst [vmem:[#allocation3 + $0xf8] sm:$0xff] %v1944_v15 }
  0x6e PF: > { %p555_p3 = scmp.lt.s32.totalorder %s2053_s9, 0  ;;  %s556_s16 = ssub.s32 0, %s2053_s9 }
  0x6f   : > { %s1559_s22 = smin.u32 %s2053_s9, %s556_s16  ;;  %p561_p9 = scmp.gt.s32.totalorder %s2053_s9, 0 }
  0x70   : > { %s558_s23 = sand.u32 1, %s1559_s22  }
  0x71   : > { %s559_s24 = ssub.s32 0, %s558_s23 }
  0x72   : > { %s2490_s24 = smov (!%p555_p3, %s559_s24), %s558_s23 }
  0x73   : > { %p562_p10 = scmp.eq.s32.totalorder %s2490_s24, 1 }
  0x75   : > { %p563_p11 = pnand %p562_p10, %p561_p9 }
  0x76   : > { %v612_v16 = vld [vmem:[#allocation2 + $0x40] sm:$0xff] (!%p563_p11)  ;;  %v613_v18 = vld [vmem:[#allocation2 + $0x48] sm:$0xff] (!%p563_p11)  ;;  %v614_v20 = vld [vmem:[#allocation2 + $0x50] sm:$0xff] (!%p563_p11)  ;;  %p1576_p12 = scmp.ne.s32.totalorder (!%p563_p11), %s2053_s9, 3 }
  0x77   : > { %566 = sbr.rel (%p563_p11) target bundleno = 453 (0x1c5), region = 44  ;;  %v604_v17 = vld [vmem:[#allocation2] sm:$0xff] (!%p563_p11)  ;;  %1584 = vmatprep.subr.bf16.mxu0 (!%p563_p11), %v612_v16  ;;  %1808 = vmatprep.subr.bf16.mxu1 (!%p563_p11), %v612_v16  ;;  %v605_v19 = vld [vmem:[#allocation2 + $0x8] sm:$0xff] (!%p563_p11)  ;;  %v606_v23 = vld [vmem:[#allocation2 + $0x10] sm:$0xff] (!%p563_p11) }
  0x78   : > { %1585 = vmatpush3.bf16.msra.mxu0 (!%p563_p11), %v604_v17  ;;  %1816 = vmatpush3.bf16.msra.mxu1 (!%p563_p11), %v604_v17  ;;  %v573_v21 = vld [vmem:[#allocation3 + $0x8] sm:$0xff] (!%p563_p11)  ;;  %v615_v24 = vld [vmem:[#allocation2 + $0x58] sm:$0xff] (!%p563_p11)  ;;  %v616_v26 = vld [vmem:[#allocation2 + $0x60] sm:$0xff] (!%p563_p11) }
  0x79   : > { %1586 = vmatprep.subr.bf16.mxu0 (!%p563_p11), %v613_v18  ;;  %1809 = vmatprep.subr.bf16.mxu1 (!%p563_p11), %v613_v18  ;;  %v589_v22 = vld [vmem:[#allocation3 + $0x88] sm:$0xff] (!%p563_p11)  ;;  %v607_v25 = vld [vmem:[#allocation2 + $0x18] sm:$0xff] (!%p563_p11)  ;;  %v608_v27 = vld [vmem:[#allocation2 + $0x20] sm:$0xff] (!%p563_p11) }
  0x7a   : > { %652 = vmatprep.mubr.bf16.mxu0 (!%p563_p11), %v573_v21  ;;  %716 = vmatprep.mubr.bf16.mxu1 (!%p563_p11), %v589_v22  ;;  %v617_v28 = vld [vmem:[#allocation2 + $0x68] sm:$0xff] (!%p563_p11)  ;;  %v618_v30 = vld [vmem:[#allocation2 + $0x70] sm:$0xff] (!%p563_p11)  ;;  %v619_v32 = vld [vmem:[#allocation2 + $0x78] sm:$0xff] (!%p563_p11) }
  0x7b   : > { %v609_v29 = vld [vmem:[#allocation2 + $0x28] sm:$0xff] (!%p563_p11)  ;;  %v610_v31 = vld [vmem:[#allocation2 + $0x30] sm:$0xff] (!%p563_p11)  ;;  %v611_v33 = vld [vmem:[#allocation2 + $0x38] sm:$0xff] (!%p563_p11) }
  0x7c   : > { %1587 = vmatpush3.bf16.msra.mxu0 (!%p563_p11), %v605_v19  ;;  %1817 = vmatpush3.bf16.msra.mxu1 (!%p563_p11), %v605_v19  ;;  %v572_v34 = vld [vmem:[#allocation3] sm:$0xff] (!%p563_p11)  ;;  %v575_v36 = vld [vmem:[#allocation3 + $0x18] sm:$0xff] (!%p563_p11)  ;;  %v574_v38 = vld [vmem:[#allocation3 + $0x10] sm:$0xff] (!%p563_p11) }
  0x7d   : > { %1588 = vmatprep.subr.bf16.mxu0 (!%p563_p11), %v614_v20  ;;  %1810 = vmatprep.subr.bf16.mxu1 (!%p563_p11), %v614_v20  ;;  %v588_v35 = vld [vmem:[#allocation3 + $0x80] sm:$0xff] (!%p563_p11)  ;;  %v591_v37 = vld [vmem:[#allocation3 + $0x98] sm:$0xff] (!%p563_p11)  ;;  %v590_v39 = vld [vmem:[#allocation3 + $0x90] sm:$0xff] (!%p563_p11) }
  0x7e   : > { %v577_v40 = vld [vmem:[#allocation3 + $0x28] sm:$0xff]  ;;  %v576_v42 = vld [vmem:[#allocation3 + $0x20] sm:$0xff]  ;;  %v579_v44 = vld [vmem:[#allocation3 + $0x38] sm:$0xff] }
  0x7f   : > { %v593_v41 = vld [vmem:[#allocation3 + $0xa8] sm:$0xff]  ;;  %v592_v43 = vld [vmem:[#allocation3 + $0xa0] sm:$0xff]  ;;  %v595_v45 = vld [vmem:[#allocation3 + $0xb8] sm:$0xff] }
  0x80   : > { %1589 = vmatpush3.bf16.msra.mxu0 %v606_v23  ;;  %1818 = vmatpush3.bf16.msra.mxu1 %v606_v23  ;;  %v578_v46 = vld [vmem:[#allocation3 + $0x30] sm:$0xff]  ;;  %v581_v48 = vld [vmem:[#allocation3 + $0x48] sm:$0xff]  ;;  %v580_v50 = vld [vmem:[#allocation3 + $0x40] sm:$0xff] }
  0x81   : > { %1590 = vmatprep.subr.bf16.mxu0 %v615_v24  ;;  %1811 = vmatprep.subr.bf16.mxu1 %v615_v24  ;;  %v594_v47 = vld [vmem:[#allocation3 + $0xb0] sm:$0xff]  ;;  %v597_v49 = vld [vmem:[#allocation3 + $0xc8] sm:$0xff]  ;;  %v596_v51 = vld [vmem:[#allocation3 + $0xc0] sm:$0xff] }
  0x82   : > { %v583_v52 = vld [vmem:[#allocation3 + $0x58] sm:$0xff]  ;;  %v582_v54 = vld [vmem:[#allocation3 + $0x50] sm:$0xff]  ;;  %v585_v56 = vld [vmem:[#allocation3 + $0x68] sm:$0xff] }
  0x83   : > { %v599_v53 = vld [vmem:[#allocation3 + $0xd8] sm:$0xff]  ;;  %v598_v55 = vld [vmem:[#allocation3 + $0xd0] sm:$0xff]  ;;  %v601_v57 = vld [vmem:[#allocation3 + $0xe8] sm:$0xff] }
  0x84   : > { %1591 = vmatpush3.bf16.msra.mxu0 %v607_v25  ;;  %1819 = vmatpush3.bf16.msra.mxu1 %v607_v25  ;;  %v584_v58 = vld [vmem:[#allocation3 + $0x60] sm:$0xff]  ;;  %v587_v60 = vld [vmem:[#allocation3 + $0x78] sm:$0xff]  ;;  %v586_v62 = vld [vmem:[#allocation3 + $0x70] sm:$0xff] }
  0x85   : > { %1592 = vmatprep.subr.bf16.mxu0 %v616_v26  ;;  %1812 = vmatprep.subr.bf16.mxu1 %v616_v26  ;;  %v600_v59 = vld [vmem:[#allocation3 + $0xe0] sm:$0xff]  ;;  %v603_v61 = vld [vmem:[#allocation3 + $0xf8] sm:$0xff]  ;;  %v602_v63 = vld [vmem:[#allocation3 + $0xf0] sm:$0xff] }
  0x86   : > { %v817_v3 = vld [vmem:[#allocation9] sm:$0xff]  ;;  %v818_v11 = vld [vmem:[#allocation9 + $0x8] sm:$0xff]  ;;  %v819_v25 = vld [vmem:[#allocation9 + $0x10] sm:$0xff] }
  0x87   : > { %v833_v5 = vld [vmem:[#allocation9 + $0x80] sm:$0xff]  ;;  %v834_v13 = vld [vmem:[#allocation9 + $0x88] sm:$0xff] }
  0x88   : > { %1593 = vmatpush3.bf16.msra.mxu0 %v608_v27  ;;  %1820 = vmatpush3.bf16.msra.mxu1 %v608_v27  ;;  %v835_v27 = vld [vmem:[#allocation9 + $0x90] sm:$0xff] }
  0x89   : > { %1594 = vmatprep.subr.bf16.mxu0 %v617_v28  ;;  %1813 = vmatprep.subr.bf16.mxu1 %v617_v28 }
  0x8c   : > { %1595 = vmatpush3.bf16.msra.mxu0 %v609_v29  ;;  %1821 = vmatpush3.bf16.msra.mxu1 %v609_v29 }
  0x8d   : > { %1596 = vmatprep.subr.bf16.mxu0 %v618_v30  ;;  %1814 = vmatprep.subr.bf16.mxu1 %v618_v30 }
  0x90   : > { %1597 = vmatpush3.bf16.msra.mxu0 %v610_v31  ;;  %1822 = vmatpush3.bf16.msra.mxu1 %v610_v31 }
  0x91   : > { %1598 = vmatprep.subr.bf16.mxu0 %v619_v32  ;;  %1815 = vmatprep.subr.bf16.mxu1 %v619_v32 }
  0x94   : > { %1599 = vmatpush3.bf16.msra.mxu0 %v611_v33  ;;  %1823 = vmatpush3.bf16.msra.mxu1 %v611_v33  ;;  %v820_v33 = vld [vmem:[#allocation9 + $0x18] sm:$0xff] }
  0x97   : > { %653 = vmatmul.mubr.bf16.vlgmr.msra.gmra.mrb[0].mxu0 %v572_v34  ;;  %717 = vmatmul.mubr.bf16.vlgmr.msra.gmra.mrb[0].mxu1 %v588_v35  ;;  %v836_v35 = vld [vmem:[#allocation9 + $0x98] sm:$0xff] }
  0x98   : > { %660 = vmatprep.mubr.bf16.mxu0 %v575_v36  ;;  %724 = vmatprep.mubr.bf16.mxu1 %v591_v37 }
  0x9f   : > { %661 = vmatmul.mubr.bf16.gmra.mrb[4].mxu0 %v574_v38  ;;  %725 = vmatmul.mubr.bf16.gmra.mrb[4].mxu1 %v590_v39 }
  0xa0   : > { %668 = vmatprep.mubr.bf16.mxu0 %v577_v40  ;;  %732 = vmatprep.mubr.bf16.mxu1 %v593_v41 }
  0xa7   : > { %669 = vmatmul.mubr.bf16.gmra.mrb[8].mxu0 %v576_v42  ;;  %733 = vmatmul.mubr.bf16.gmra.mrb[8].mxu1 %v592_v43 }
  0xa8   : > { %676 = vmatprep.mubr.bf16.mxu0 %v579_v44  ;;  %740 = vmatprep.mubr.bf16.mxu1 %v595_v45 }
  0xaf   : > { %677 = vmatmul.mubr.bf16.gmra.mrb[12].mxu0 %v578_v46  ;;  %741 = vmatmul.mubr.bf16.gmra.mrb[12].mxu1 %v594_v47  ;;  %v821_v47 = vld [vmem:[#allocation9 + $0x20] sm:$0xff] }
  0xb0   : > { %684 = vmatprep.mubr.bf16.mxu0 %v581_v48  ;;  %748 = vmatprep.mubr.bf16.mxu1 %v597_v49  ;;  %v837_v49 = vld [vmem:[#allocation9 + $0xa0] sm:$0xff] }
  0xb7   : > { %685 = vmatmul.mubr.bf16.gmra.mrb[16].mxu0 %v580_v50  ;;  %749 = vmatmul.mubr.bf16.gmra.mrb[16].mxu1 %v596_v51 }
  0xb8   : > { %692 = vmatprep.mubr.bf16.mxu0 %v583_v52  ;;  %756 = vmatprep.mubr.bf16.mxu1 %v599_v53 }
  0xbf   : > { %693 = vmatmul.mubr.bf16.gmra.mrb[20].mxu0 %v582_v54  ;;  %757 = vmatmul.mubr.bf16.gmra.mrb[20].mxu1 %v598_v55  ;;  %v822_v55 = vld [vmem:[#allocation9 + $0x28] sm:$0xff] }
  0xc0   : > { %700 = vmatprep.mubr.bf16.mxu0 %v585_v56  ;;  %764 = vmatprep.mubr.bf16.mxu1 %v601_v57  ;;  %v838_v57 = vld [vmem:[#allocation9 + $0xa8] sm:$0xff] }
  0xc7   : > { %701 = vmatmul.mubr.bf16.gmra.mrb[24].mxu0 %v584_v58  ;;  %765 = vmatmul.mubr.bf16.gmra.mrb[24].mxu1 %v600_v59 }
  0xc8   : > { %708 = vmatprep.mubr.bf16.mxu0 %v587_v60  ;;  %772 = vmatprep.mubr.bf16.mxu1 %v603_v61 }
  0xcf   : > { %709 = vmatmul.mubr.bf16.gmra.mrb[28].mxu0 %v586_v62  ;;  %773 = vmatmul.mubr.bf16.gmra.mrb[28].mxu1 %v602_v63 }
 0x16a   : > { %v1600_v0 = vpop.f32.mrb[0].mxu0  ;;  %v1648_v1 = vpop.f32.mrb[0].mxu1 }
 0x16b   : > { %v1601_v2 = vpop.f32.mrb[1].mxu0  ;;  %v1649_v4 = vpop.f32.mrb[1].mxu1 }
 0x16c   : > { %v1602_v6 = vadd.f32 %v1601_v2, %v1600_v0  ;;  %v1650_v7 = vadd.f32 %v1649_v4, %v1648_v1  ;;  %v1603_v8 = vpop.f32.mrb[2].mxu0  ;;  %v1651_v9 = vpop.f32.mrb[2].mxu1 }
 0x16d   : > { %v1604_v10 = vpop.f32.mrb[3].mxu0  ;;  %v1652_v12 = vpop.f32.mrb[3].mxu1 }
 0x16e   : > { %v2176_v14 = vadd.f32 %v1602_v6, %v817_v3  ;;  %v2178_v15 = vadd.f32 %v1650_v7, %v833_v5  ;;  %v1605_v16 = vadd.f32 %v1604_v10, %v1603_v8  ;;  %v1653_v17 = vadd.f32 %v1652_v12, %v1651_v9  ;;  %v823_v5 = vld [vmem:[#allocation9 + $0x30] sm:$0xff] }
 0x170   : > { %v781_v18 = vpack.c.bf16 %v1605_v16, %v1602_v6  ;;  %v2180_v19 = vadd.f32 %v1605_v16, %v818_v11  ;;  %v789_v20 = vpack.c.bf16 %v1653_v17, %v1650_v7  ;;  %v2182_v21 = vadd.f32 %v1653_v17, %v834_v13  ;;  %v839_v7 = vld [vmem:[#allocation9 + $0xb0] sm:$0xff]  ;;  %v824_v13 = vld [vmem:[#allocation9 + $0x38] sm:$0xff] }
 0x171   : > { %v840_v17 = vld [vmem:[#allocation9 + $0xb8] sm:$0xff] }
 0x172   : > { %1560 = vst [vmem:[#allocation2 + $0x80] sm:$0xff] %v781_v18  ;;  %1568 = vst [vmem:[#allocation2 + $0xc0] sm:$0xff] %v789_v20  ;;  %v1606_v22 = vpop.f32.mrb[4].mxu0  ;;  %v1654_v23 = vpop.f32.mrb[4].mxu1 }
 0x173   : > { %v1607_v24 = vpop.f32.mrb[5].mxu0  ;;  %v1655_v26 = vpop.f32.mrb[5].mxu1 }
 0x174   : > { %v1608_v28 = vadd.f32 %v1607_v24, %v1606_v22  ;;  %v1656_v29 = vadd.f32 %v1655_v26, %v1654_v23  ;;  %v1609_v30 = vpop.f32.mrb[6].mxu0  ;;  %v1657_v31 = vpop.f32.mrb[6].mxu1 }
 0x175   : > { %v1610_v32 = vpop.f32.mrb[7].mxu0  ;;  %v1658_v34 = vpop.f32.mrb[7].mxu1 }
 0x176   : > { %v2184_v36 = vadd.f32 %v1608_v28, %v819_v25  ;;  %v2186_v37 = vadd.f32 %v1656_v29, %v835_v27  ;;  %v1611_v38 = vadd.f32 %v1610_v32, %v1609_v30  ;;  %v1659_v39 = vadd.f32 %v1658_v34, %v1657_v31  ;;  %v825_v31 = vld [vmem:[#allocation9 + $0x40] sm:$0xff] }
 0x178   : > { %v782_v40 = vpack.c.bf16 %v1611_v38, %v1608_v28  ;;  %v2188_v41 = vadd.f32 %v1611_v38, %v820_v33  ;;  %v790_v42 = vpack.c.bf16 %v1659_v39, %v1656_v29  ;;  %v2190_v43 = vadd.f32 %v1659_v39, %v836_v35  ;;  %v841_v33 = vld [vmem:[#allocation9 + $0xc0] sm:$0xff] }
 0x17a   : > { %1561 = vst [vmem:[#allocation2 + $0x88] sm:$0xff] %v782_v40  ;;  %1569 = vst [vmem:[#allocation2 + $0xc8] sm:$0xff] %v790_v42  ;;  %v1612_v44 = vpop.f32.mrb[8].mxu0  ;;  %v1660_v45 = vpop.f32.mrb[8].mxu1  ;;  %v826_v42 = vld [vmem:[#allocation9 + $0x48] sm:$0xff] }
 0x17b   : > { %v1613_v46 = vpop.f32.mrb[9].mxu0  ;;  %v1661_v48 = vpop.f32.mrb[9].mxu1 }
 0x17c   : > { %v1614_v50 = vadd.f32 %v1613_v46, %v1612_v44  ;;  %v1662_v51 = vadd.f32 %v1661_v48, %v1660_v45  ;;  %v1615_v52 = vpop.f32.mrb[10].mxu0  ;;  %v1663_v53 = vpop.f32.mrb[10].mxu1  ;;  %v842_v45 = vld [vmem:[#allocation9 + $0xc8] sm:$0xff] }
 0x17d   : > { %v1616_v54 = vpop.f32.mrb[11].mxu0  ;;  %v1664_v56 = vpop.f32.mrb[11].mxu1 }
 0x17e   : > { %v2192_v58 = vadd.f32 %v1614_v50, %v821_v47  ;;  %v2194_v59 = vadd.f32 %v1662_v51, %v837_v49  ;;  %v1617_v60 = vadd.f32 %v1616_v54, %v1615_v52  ;;  %v1665_v61 = vadd.f32 %v1664_v56, %v1663_v53 }
 0x180   : > { %v783_v62 = vpack.c.bf16 %v1617_v60, %v1614_v50  ;;  %v2196_v63 = vadd.f32 %v1617_v60, %v822_v55  ;;  %v791_v0 = vpack.c.bf16 %v1665_v61, %v1662_v51  ;;  %v2198_v1 = vadd.f32 %v1665_v61, %v838_v57  ;;  %v827_v57 = vld [vmem:[#allocation9 + $0x50] sm:$0xff] }
 0x181   : > { %v843_v61 = vld [vmem:[#allocation9 + $0xd0] sm:$0xff] }
 0x182   : > { %1562 = vst [vmem:[#allocation2 + $0x90] sm:$0xff] %v783_v62  ;;  %1570 = vst [vmem:[#allocation2 + $0xd0] sm:$0xff] %v791_v0  ;;  %v1618_v2 = vpop.f32.mrb[12].mxu0  ;;  %v1666_v3 = vpop.f32.mrb[12].mxu1 }
 0x183   : > { %v1619_v4 = vpop.f32.mrb[13].mxu0  ;;  %v1667_v6 = vpop.f32.mrb[13].mxu1 }
 0x184   : > { %v1620_v8 = vadd.f32 %v1619_v4, %v1618_v2  ;;  %v1668_v9 = vadd.f32 %v1667_v6, %v1666_v3  ;;  %v1621_v10 = vpop.f32.mrb[14].mxu0  ;;  %v1669_v11 = vpop.f32.mrb[14].mxu1 }
 0x185   : > { %v1622_v12 = vpop.f32.mrb[15].mxu0  ;;  %v1670_v16 = vpop.f32.mrb[15].mxu1 }
 0x186   : > { %v2200_v18 = vadd.f32 %v1620_v8, %v823_v5  ;;  %v2202_v20 = vadd.f32 %v1668_v9, %v839_v7  ;;  %v1623_v22 = vadd.f32 %v1622_v12, %v1621_v10  ;;  %v1671_v23 = vadd.f32 %v1670_v16, %v1669_v11  ;;  %v828_v5 = vld [vmem:[#allocation9 + $0x58] sm:$0xff] }
 0x187   : > { %v844_v7 = vld [vmem:[#allocation9 + $0xd8] sm:$0xff] }
 0x188   : > { %v784_v24 = vpack.c.bf16 %v1623_v22, %v1620_v8  ;;  %v2204_v25 = vadd.f32 %v1623_v22, %v824_v13  ;;  %v792_v26 = vpack.c.bf16 %v1671_v23, %v1668_v9  ;;  %v2206_v27 = vadd.f32 %v1671_v23, %v840_v17 }
 0x18a   : > { %1563 = vst [vmem:[#allocation2 + $0x98] sm:$0xff] %v784_v24  ;;  %1571 = vst [vmem:[#allocation2 + $0xd8] sm:$0xff] %v792_v26  ;;  %v1624_v28 = vpop.f32.mrb[16].mxu0  ;;  %v1672_v29 = vpop.f32.mrb[16].mxu1  ;;  %v829_v26 = vld [vmem:[#allocation9 + $0x60] sm:$0xff] }
 0x18b   : > { %v1625_v30 = vpop.f32.mrb[17].mxu0  ;;  %v1673_v32 = vpop.f32.mrb[17].mxu1 }
 0x18c   : > { %v1626_v34 = vadd.f32 %v1625_v30, %v1624_v28  ;;  %v1674_v35 = vadd.f32 %v1673_v32, %v1672_v29  ;;  %v1627_v38 = vpop.f32.mrb[18].mxu0  ;;  %v1675_v39 = vpop.f32.mrb[18].mxu1  ;;  %v845_v29 = vld [vmem:[#allocation9 + $0xe0] sm:$0xff] }
 0x18d   : > { %v1628_v40 = vpop.f32.mrb[19].mxu0  ;;  %v1676_v44 = vpop.f32.mrb[19].mxu1 }
 0x18e   : > { %v2208_v46 = vadd.f32 %v1626_v34, %v825_v31  ;;  %v2210_v47 = vadd.f32 %v1674_v35, %v841_v33  ;;  %v1629_v48 = vadd.f32 %v1628_v40, %v1627_v38  ;;  %v1677_v49 = vadd.f32 %v1676_v44, %v1675_v39  ;;  %v846_v39 = vld [vmem:[#allocation9 + $0xe8] sm:$0xff] }
 0x190   : > { %v785_v50 = vpack.c.bf16 %v1629_v48, %v1626_v34  ;;  %v2212_v51 = vadd.f32 %v1629_v48, %v826_v42  ;;  %v793_v52 = vpack.c.bf16 %v1677_v49, %v1674_v35  ;;  %v2214_v53 = vadd.f32 %v1677_v49, %v842_v45  ;;  %v830_v35 = vld [vmem:[#allocation9 + $0x68] sm:$0xff] }
 0x192   : > { %1564 = vst [vmem:[#allocation2 + $0xa0] sm:$0xff] %v785_v50  ;;  %1572 = vst [vmem:[#allocation2 + $0xe0] sm:$0xff] %v793_v52  ;;  %v1630_v54 = vpop.f32.mrb[20].mxu0  ;;  %v1678_v55 = vpop.f32.mrb[20].mxu1 }
 0x193   : > { %v1631_v56 = vpop.f32.mrb[21].mxu0  ;;  %v1679_v60 = vpop.f32.mrb[21].mxu1 }
 0x194   : > { %v1632_v62 = vadd.f32 %v1631_v56, %v1630_v54  ;;  %v1680_v0 = vadd.f32 %v1679_v60, %v1678_v55  ;;  %v1633_v2 = vpop.f32.mrb[22].mxu0  ;;  %v1681_v3 = vpop.f32.mrb[22].mxu1 }
 0x195   : > { %v1634_v4 = vpop.f32.mrb[23].mxu0  ;;  %v1682_v6 = vpop.f32.mrb[23].mxu1 }
 0x196   : > { %v2216_v8 = vadd.f32 %v1632_v62, %v827_v57  ;;  %v2218_v9 = vadd.f32 %v1680_v0, %v843_v61  ;;  %v1635_v10 = vadd.f32 %v1634_v4, %v1633_v2  ;;  %v1683_v11 = vadd.f32 %v1682_v6, %v1681_v3  ;;  %v831_v57 = vld [vmem:[#allocation9 + $0x70] sm:$0xff] }
 0x197   : > { %v847_v61 = vld [vmem:[#allocation9 + $0xf0] sm:$0xff] }
 0x198   : > { %v786_v12 = vpack.c.bf16 %v1635_v10, %v1632_v62  ;;  %v2220_v13 = vadd.f32 %v1635_v10, %v828_v5  ;;  %v794_v16 = vpack.c.bf16 %v1683_v11, %v1680_v0  ;;  %v2222_v17 = vadd.f32 %v1683_v11, %v844_v7  ;;  %v832_v5 = vld [vmem:[#allocation9 + $0x78] sm:$0xff] }
 0x199   : > { %v848_v7 = vld [vmem:[#allocation9 + $0xf8] sm:$0xff] }
 0x19a   : > { %1565 = vst [vmem:[#allocation2 + $0xa8] sm:$0xff] %v786_v12  ;;  %1573 = vst [vmem:[#allocation2 + $0xe8] sm:$0xff] %v794_v16  ;;  %v1636_v22 = vpop.f32.mrb[24].mxu0  ;;  %v1684_v23 = vpop.f32.mrb[24].mxu1 }
 0x19b   : > { %v1637_v24 = vpop.f32.mrb[25].mxu0  ;;  %v1685_v28 = vpop.f32.mrb[25].mxu1 }
 0x19c   : > { %v1638_v30 = vadd.f32 %v1637_v24, %v1636_v22  ;;  %v1686_v31 = vadd.f32 %v1685_v28, %v1684_v23  ;;  %v1639_v32 = vpop.f32.mrb[26].mxu0  ;;  %v1687_v33 = vpop.f32.mrb[26].mxu1  ;;  %v885_v28 = vmul.f32 (!%p1576_p12), 0.25, %v2176_v14 }
 0x19d   : > { %v1640_v34 = vpop.f32.mrb[27].mxu0  ;;  %v1688_v38 = vpop.f32.mrb[27].mxu1 }
 0x19e   : > { %v2224_v40 = vadd.f32 %v1638_v30, %v829_v26  ;;  %v2226_v42 = vadd.f32 %v1686_v31, %v845_v29  ;;  %v1641_v44 = vadd.f32 %v1640_v34, %v1639_v32  ;;  %v1689_v45 = vadd.f32 %v1688_v38, %v1687_v33  ;;  %917 = vst [vmem:[#allocation9] sm:$0xff] (!%p1576_p12), %v885_v28 }
 0x19f   : > { %v886_v29 = vmul.f32 (!%p1576_p12), 0.25, %v2180_v19  ;;  %v889_v32 = vmul.f32 (!%p1576_p12), 0.25, %v2192_v58  ;;  %v890_v33 = vmul.f32 (!%p1576_p12), 0.25, %v2196_v63  ;;  %v891_v34 = vmul.f32 (!%p1576_p12), 0.25, %v2200_v18 }
 0x1a0   : > { %v787_v48 = vpack.c.bf16 %v1641_v44, %v1638_v30  ;;  %v2228_v49 = vadd.f32 %v1641_v44, %v830_v35  ;;  %v795_v50 = vpack.c.bf16 %v1689_v45, %v1686_v31  ;;  %v2230_v52 = vadd.f32 %v1689_v45, %v846_v39 }
 0x1a1   : > { %v887_v30 = vmul.f32 (!%p1576_p12), 0.25, %v2184_v36  ;;  %v888_v31 = vmul.f32 (!%p1576_p12), 0.25, %v2188_v41  ;;  %v892_v35 = vmul.f32 (!%p1576_p12), 0.25, %v2204_v25  ;;  %918 = vst [vmem:[#allocation9 + $0x8] sm:$0xff] (!%p1576_p12), %v886_v29  ;;  %v893_v38 = vmul.f32 (!%p1576_p12), 0.25, %v2208_v46  ;;  %921 = vst [vmem:[#allocation9 + $0x20] sm:$0xff] (!%p1576_p12), %v889_v32 }
 0x1a2   : > { %1566 = vst [vmem:[#allocation2 + $0xb0] sm:$0xff] %v787_v48  ;;  %1574 = vst [vmem:[#allocation2 + $0xf0] sm:$0xff] %v795_v50  ;;  %v1642_v54 = vpop.f32.mrb[28].mxu0  ;;  %v1690_v55 = vpop.f32.mrb[28].mxu1  ;;  %v894_v39 = vmul.f32 (!%p1576_p12), 0.25, %v2212_v51  ;;  %v895_v44 = vmul.f32 (!%p1576_p12), 0.25, %v2216_v8 }
 0x1a3   : > { %v1643_v56 = vpop.f32.mrb[29].mxu0  ;;  %v1691_v60 = vpop.f32.mrb[29].mxu1  ;;  %919 = vst [vmem:[#allocation9 + $0x10] sm:$0xff] (!%p1576_p12), %v887_v30  ;;  %920 = vst [vmem:[#allocation9 + $0x18] sm:$0xff] (!%p1576_p12), %v888_v31  ;;  %v896_v45 = vmul.f32 (!%p1576_p12), 0.25, %v2220_v13  ;;  %v897_v48 = vmul.f32 (!%p1576_p12), 0.25, %v2224_v40 }
 0x1a4   : > { %v1644_v62 = vadd.f32 %v1643_v56, %v1642_v54  ;;  %v1692_v0 = vadd.f32 %v1691_v60, %v1690_v55  ;;  %v1645_v2 = vpop.f32.mrb[30].mxu0  ;;  %v1693_v3 = vpop.f32.mrb[30].mxu1  ;;  %884 = sbr.rel (%p1576_p12) target bundleno = 436 (0x1b4), region = 48  ;;  %922 = vst [vmem:[#allocation9 + $0x28] sm:$0xff] (!%p1576_p12), %v890_v33  ;;  %923 = vst [vmem:[#allocation9 + $0x30] sm:$0xff] (!%p1576_p12), %v891_v34  ;;  %v898_v50 = vmul.f32 (!%p1576_p12), 0.25, %v2228_v49 }
 0x1a5   : > { %v1646_v4 = vpop.f32.mrb[31].mxu0  ;;  %v1694_v6 = vpop.f32.mrb[31].mxu1  ;;  %924 = vst [vmem:[#allocation9 + $0x38] sm:$0xff] (!%p1576_p12), %v892_v35  ;;  %925 = vst [vmem:[#allocation9 + $0x40] sm:$0xff] (!%p1576_p12), %v893_v38  ;;  %v901_v56 = vmul.f32 (!%p1576_p12), 0.25, %v2178_v15  ;;  %v903_v60 = vmul.f32 (!%p1576_p12), 0.25, %v2186_v37 }
 0x1a6   : > { %v2232_v10 = vadd.f32 %v1644_v62, %v831_v57  ;;  %v2234_v11 = vadd.f32 %v1692_v0, %v847_v61  ;;  %v1647_v12 = vadd.f32 %v1646_v4, %v1645_v2  ;;  %v1695_v16 = vadd.f32 %v1694_v6, %v1693_v3  ;;  %926 = vst [vmem:[#allocation9 + $0x48] sm:$0xff] (!%p1576_p12), %v894_v39 }
 0x1a7   : > { %927 = vst [vmem:[#allocation9 + $0x50] sm:$0xff] (!%p1576_p12), %v895_v44  ;;  %928 = vst [vmem:[#allocation9 + $0x58] sm:$0xff] (!%p1576_p12), %v896_v45  ;;  %v902_v57 = vmul.f32 (!%p1576_p12), 0.25, %v2182_v21  ;;  %v904_v61 = vmul.f32 (!%p1576_p12), 0.25, %v2190_v43  ;;  %v907_v2 = vmul.f32 (!%p1576_p12), 0.25, %v2202_v20  ;;  %v908_v3 = vmul.f32 (!%p1576_p12), 0.25, %v2206_v27 }
 0x1a8   : > { %v788_v22 = vpack.c.bf16 %v1647_v12, %v1644_v62  ;;  %v2236_v23 = vadd.f32 %v1647_v12, %v832_v5  ;;  %v796_v24 = vpack.c.bf16 %v1695_v16, %v1692_v0  ;;  %v2238_v26 = vadd.f32 %v1695_v16, %v848_v7  ;;  %929 = vst [vmem:[#allocation9 + $0x60] sm:$0xff] (!%p1576_p12), %v897_v48 }
 0x1a9   : > { %v899_v54 = vmul.f32 (!%p1576_p12), 0.25, %v2232_v10  ;;  %930 = vst [vmem:[#allocation9 + $0x68] sm:$0xff] (!%p1576_p12), %v898_v50  ;;  %v905_v62 = vmul.f32 (!%p1576_p12), 0.25, %v2194_v59  ;;  %v906_v0 = vmul.f32 (!%p1576_p12), 0.25, %v2198_v1  ;;  %933 = vst [vmem:[#allocation9 + $0x80] sm:$0xff] (!%p1576_p12), %v901_v56  ;;  %v909_v4 = vmul.f32 (!%p1576_p12), 0.25, %v2210_v47 }
 0x1aa   : > { %1567 = vst [vmem:[#allocation2 + $0xb8] sm:$0xff] %v788_v22  ;;  %1575 = vst [vmem:[#allocation2 + $0xf8] sm:$0xff] %v796_v24  ;;  %v900_v55 = vmul.f32 (!%p1576_p12), 0.25, %v2236_v23  ;;  %v910_v5 = vmul.f32 (!%p1576_p12), 0.25, %v2214_v53  ;;  %v911_v6 = vmul.f32 (!%p1576_p12), 0.25, %v2218_v9  ;;  %v912_v7 = vmul.f32 (!%p1576_p12), 0.25, %v2222_v17 }
 0x1ab   : > { %931 = vst [vmem:[#allocation9 + $0x70] sm:$0xff] %v899_v54  ;;  %934 = vst [vmem:[#allocation9 + $0x88] sm:$0xff] %v902_v57  ;;  %v913_v12 = vmul.f32 0.25, %v2226_v42  ;;  %v914_v16 = vmul.f32 0.25, %v2230_v52  ;;  %v915_v22 = vmul.f32 0.25, %v2234_v11  ;;  %v916_v24 = vmul.f32 0.25, %v2238_v26 }
 0x1ac   : > { %932 = vst [vmem:[#allocation9 + $0x78] sm:$0xff] %v900_v55  ;;  %935 = vst [vmem:[#allocation9 + $0x90] sm:$0xff] %v903_v60 }
 0x1ad   : > { %936 = vst [vmem:[#allocation9 + $0x98] sm:$0xff] %v904_v61  ;;  %937 = vst [vmem:[#allocation9 + $0xa0] sm:$0xff] %v905_v62 }
 0x1ae   : > { %938 = vst [vmem:[#allocation9 + $0xa8] sm:$0xff] %v906_v0  ;;  %939 = vst [vmem:[#allocation9 + $0xb0] sm:$0xff] %v907_v2 }
 0x1af   : > { %940 = vst [vmem:[#allocation9 + $0xb8] sm:$0xff] %v908_v3  ;;  %941 = vst [vmem:[#allocation9 + $0xc0] sm:$0xff] %v909_v4 }
 0x1b0   : > { %942 = vst [vmem:[#allocation9 + $0xc8] sm:$0xff] %v910_v5  ;;  %943 = vst [vmem:[#allocation9 + $0xd0] sm:$0xff] %v911_v6 }
 0x1b1   : > { %944 = vst [vmem:[#allocation9 + $0xd8] sm:$0xff] %v912_v7  ;;  %945 = vst [vmem:[#allocation9 + $0xe0] sm:$0xff] %v913_v12 }
 0x1b2   : > { %946 = vst [vmem:[#allocation9 + $0xe8] sm:$0xff] %v914_v16  ;;  %947 = vst [vmem:[#allocation9 + $0xf0] sm:$0xff] %v915_v22 }
 0x1b3   : > { %948 = vst [vmem:[#allocation9 + $0xf8] sm:$0xff] %v916_v24 }
 0x1b4 PF: > { %p1577_p13 = scmp.ge.s32.totalorder %s2053_s9, 3 }
 0x1b5   : > { %953 = vst [vmem:[#allocation9] sm:$0xff] (!%p1577_p13), %v2176_v14  ;;  %954 = vst [vmem:[#allocation9 + $0x8] sm:$0xff] (!%p1577_p13), %v2180_v19 }
 0x1b6   : > { %952 = sbr.rel (%p1577_p13) target bundleno = 453 (0x1c5), region = 52  ;;  %955 = vst [vmem:[#allocation9 + $0x10] sm:$0xff] (!%p1577_p13), %v2184_v36  ;;  %956 = vst [vmem:[#allocation9 + $0x18] sm:$0xff] (!%p1577_p13), %v2188_v41 }
 0x1b7   : > { %957 = vst [vmem:[#allocation9 + $0x20] sm:$0xff] (!%p1577_p13), %v2192_v58  ;;  %958 = vst [vmem:[#allocation9 + $0x28] sm:$0xff] (!%p1577_p13), %v2196_v63 }
 0x1b8   : > { %959 = vst [vmem:[#allocation9 + $0x30] sm:$0xff] (!%p1577_p13), %v2200_v18  ;;  %960 = vst [vmem:[#allocation9 + $0x38] sm:$0xff] (!%p1577_p13), %v2204_v25 }
 0x1b9   : > { %961 = vst [vmem:[#allocation9 + $0x40] sm:$0xff] (!%p1577_p13), %v2208_v46  ;;  %962 = vst [vmem:[#allocation9 + $0x48] sm:$0xff] (!%p1577_p13), %v2212_v51 }
 0x1ba   : > { %963 = vst [vmem:[#allocation9 + $0x50] sm:$0xff] (!%p1577_p13), %v2216_v8  ;;  %964 = vst [vmem:[#allocation9 + $0x58] sm:$0xff] (!%p1577_p13), %v2220_v13 }
 0x1bb   : > { %965 = vst [vmem:[#allocation9 + $0x60] sm:$0xff] (!%p1577_p13), %v2224_v40  ;;  %966 = vst [vmem:[#allocation9 + $0x68] sm:$0xff] (!%p1577_p13), %v2228_v49 }
 0x1bc   : > { %967 = vst [vmem:[#allocation9 + $0x70] sm:$0xff] (!%p1577_p13), %v2232_v10  ;;  %968 = vst [vmem:[#allocation9 + $0x78] sm:$0xff] (!%p1577_p13), %v2236_v23 }
 0x1bd   : > { %969 = vst [vmem:[#allocation9 + $0x80] sm:$0xff] %v2178_v15  ;;  %970 = vst [vmem:[#allocation9 + $0x88] sm:$0xff] %v2182_v21 }
 0x1be   : > { %971 = vst [vmem:[#allocation9 + $0x90] sm:$0xff] %v2186_v37  ;;  %972 = vst [vmem:[#allocation9 + $0x98] sm:$0xff] %v2190_v43 }
 0x1bf   : > { %973 = vst [vmem:[#allocation9 + $0xa0] sm:$0xff] %v2194_v59  ;;  %974 = vst [vmem:[#allocation9 + $0xa8] sm:$0xff] %v2198_v1 }
 0x1c0   : > { %975 = vst [vmem:[#allocation9 + $0xb0] sm:$0xff] %v2202_v20  ;;  %976 = vst [vmem:[#allocation9 + $0xb8] sm:$0xff] %v2206_v27 }
 0x1c1   : > { %977 = vst [vmem:[#allocation9 + $0xc0] sm:$0xff] %v2210_v47  ;;  %978 = vst [vmem:[#allocation9 + $0xc8] sm:$0xff] %v2214_v53 }
 0x1c2   : > { %979 = vst [vmem:[#allocation9 + $0xd0] sm:$0xff] %v2218_v9  ;;  %980 = vst [vmem:[#allocation9 + $0xd8] sm:$0xff] %v2222_v17 }
 0x1c3   : > { %981 = vst [vmem:[#allocation9 + $0xe0] sm:$0xff] %v2226_v42  ;;  %982 = vst [vmem:[#allocation9 + $0xe8] sm:$0xff] %v2230_v52 }
 0x1c4   : > { %983 = vst [vmem:[#allocation9 + $0xf0] sm:$0xff] %v2234_v11  ;;  %984 = vst [vmem:[#allocation9 + $0xf8] sm:$0xff] %v2238_v26 }
 0x1c5 PF: > { %p985_p0 = scmp.eq.s32.totalorder %s2490_s24, 0 }
 0x1c7   : > { %p986_p1 = pnand %p985_p0, %p561_p9 }
 0x1c8   : > { %v1036_v14 = vld [vmem:[#allocation2 + $0xc0] sm:$0xff] (!%p986_p1)  ;;  %v1037_v19 = vld [vmem:[#allocation2 + $0xc8] sm:$0xff] (!%p986_p1)  ;;  %v1038_v36 = vld [vmem:[#allocation2 + $0xd0] sm:$0xff] (!%p986_p1)  ;;  %p1578_p2 = scmp.ne.s32.totalorder (!%p986_p1), %s2053_s9, 3 }
 0x1c9   : > { %989 = sbr.rel (%p986_p1) target bundleno = 791 (0x317), region = 56  ;;  %v1028_v15 = vld [vmem:[#allocation2 + $0x80] sm:$0xff] (!%p986_p1)  ;;  %1696 = vmatprep.subr.bf16.mxu0 (!%p986_p1), %v1036_v14  ;;  %1824 = vmatprep.subr.bf16.mxu1 (!%p986_p1), %v1036_v14  ;;  %v1029_v21 = vld [vmem:[#allocation2 + $0x88] sm:$0xff] (!%p986_p1)  ;;  %v1030_v43 = vld [vmem:[#allocation2 + $0x90] sm:$0xff] (!%p986_p1) }
 0x1ca   : > { %1697 = vmatpush3.bf16.msra.mxu0 (!%p986_p1), %v1028_v15  ;;  %1832 = vmatpush3.bf16.msra.mxu1 (!%p986_p1), %v1028_v15  ;;  %v996_v37 = vld [vmem:[#allocation3 + $0x8] sm:$0xff] (!%p986_p1)  ;;  %v1039_v58 = vld [vmem:[#allocation2 + $0xd8] sm:$0xff] (!%p986_p1)  ;;  %v1040_v63 = vld [vmem:[#allocation2 + $0xe0] sm:$0xff] (!%p986_p1) }
 0x1cb   : > { %1698 = vmatprep.subr.bf16.mxu0 (!%p986_p1), %v1037_v19  ;;  %1825 = vmatprep.subr.bf16.mxu1 (!%p986_p1), %v1037_v19  ;;  %v1012_v41 = vld [vmem:[#allocation3 + $0x88] sm:$0xff] (!%p986_p1)  ;;  %v1031_v59 = vld [vmem:[#allocation2 + $0x98] sm:$0xff] (!%p986_p1)  ;;  %v1032_v1 = vld [vmem:[#allocation2 + $0xa0] sm:$0xff] (!%p986_p1) }
 0x1cc   : > { %1076 = vmatprep.mubr.bf16.mxu0 (!%p986_p1), %v996_v37  ;;  %1140 = vmatprep.mubr.bf16.mxu1 (!%p986_p1), %v1012_v41  ;;  %v1041_v18 = vld [vmem:[#allocation2 + $0xe8] sm:$0xff] (!%p986_p1)  ;;  %v1042_v25 = vld [vmem:[#allocation2 + $0xf0] sm:$0xff] (!%p986_p1)  ;;  %v1043_v46 = vld [vmem:[#allocation2 + $0xf8] sm:$0xff] (!%p986_p1) }
 0x1cd   : > { %v1033_v20 = vld [vmem:[#allocation2 + $0xa8] sm:$0xff] (!%p986_p1)  ;;  %v1034_v27 = vld [vmem:[#allocation2 + $0xb0] sm:$0xff] (!%p986_p1)  ;;  %v1035_v47 = vld [vmem:[#allocation2 + $0xb8] sm:$0xff] (!%p986_p1) }
 0x1ce   : > { %1699 = vmatpush3.bf16.msra.mxu0 (!%p986_p1), %v1029_v21  ;;  %1833 = vmatpush3.bf16.msra.mxu1 (!%p986_p1), %v1029_v21  ;;  %v995_v51 = vld [vmem:[#allocation3] sm:$0xff] (!%p986_p1)  ;;  %v998_v8 = vld [vmem:[#allocation3 + $0x18] sm:$0xff] (!%p986_p1)  ;;  %v997_v13 = vld [vmem:[#allocation3 + $0x10] sm:$0xff] (!%p986_p1) }
 0x1cf   : > { %1700 = vmatprep.subr.bf16.mxu0 (!%p986_p1), %v1038_v36  ;;  %1826 = vmatprep.subr.bf16.mxu1 (!%p986_p1), %v1038_v36  ;;  %v1011_v53 = vld [vmem:[#allocation3 + $0x80] sm:$0xff] (!%p986_p1)  ;;  %v1014_v9 = vld [vmem:[#allocation3 + $0x98] sm:$0xff] (!%p986_p1)  ;;  %v1013_v17 = vld [vmem:[#allocation3 + $0x90] sm:$0xff] (!%p986_p1) }
 0x1d0   : > { %v1000_v40 = vld [vmem:[#allocation3 + $0x28] sm:$0xff]  ;;  %v999_v49 = vld [vmem:[#allocation3 + $0x20] sm:$0xff]  ;;  %v1002_v10 = vld [vmem:[#allocation3 + $0x38] sm:$0xff] }
 0x1d1   : > { %v1016_v42 = vld [vmem:[#allocation3 + $0xa8] sm:$0xff]  ;;  %v1015_v52 = vld [vmem:[#allocation3 + $0xa0] sm:$0xff]  ;;  %v1018_v11 = vld [vmem:[#allocation3 + $0xb8] sm:$0xff] }
 0x1d2   : > { %1701 = vmatpush3.bf16.msra.mxu0 %v1030_v43  ;;  %1834 = vmatpush3.bf16.msra.mxu1 %v1030_v43  ;;  %v1001_v23 = vld [vmem:[#allocation3 + $0x30] sm:$0xff]  ;;  %v1004_v28 = vld [vmem:[#allocation3 + $0x48] sm:$0xff]  ;;  %v1003_v30 = vld [vmem:[#allocation3 + $0x40] sm:$0xff] }
 0x1d3   : > { %1702 = vmatprep.subr.bf16.mxu0 %v1039_v58  ;;  %1827 = vmatprep.subr.bf16.mxu1 %v1039_v58  ;;  %v1017_v26 = vld [vmem:[#allocation3 + $0xb0] sm:$0xff]  ;;  %v1020_v29 = vld [vmem:[#allocation3 + $0xc8] sm:$0xff]  ;;  %v1019_v31 = vld [vmem:[#allocation3 + $0xc0] sm:$0xff] }
 0x1d4   : > { %v1006_v32 = vld [vmem:[#allocation3 + $0x58] sm:$0xff]  ;;  %v1005_v34 = vld [vmem:[#allocation3 + $0x50] sm:$0xff]  ;;  %v1008_v38 = vld [vmem:[#allocation3 + $0x68] sm:$0xff] }
 0x1d5   : > { %v1022_v33 = vld [vmem:[#allocation3 + $0xd8] sm:$0xff]  ;;  %v1021_v35 = vld [vmem:[#allocation3 + $0xd0] sm:$0xff]  ;;  %v1024_v39 = vld [vmem:[#allocation3 + $0xe8] sm:$0xff] }
 0x1d6   : > { %1703 = vmatpush3.bf16.msra.mxu0 %v1031_v59  ;;  %1835 = vmatpush3.bf16.msra.mxu1 %v1031_v59  ;;  %v1007_v44 = vld [vmem:[#allocation3 + $0x60] sm:$0xff]  ;;  %v1010_v48 = vld [vmem:[#allocation3 + $0x78] sm:$0xff]  ;;  %v1009_v54 = vld [vmem:[#allocation3 + $0x70] sm:$0xff] }
 0x1d7   : > { %1704 = vmatprep.subr.bf16.mxu0 %v1040_v63  ;;  %1828 = vmatprep.subr.bf16.mxu1 %v1040_v63  ;;  %v1023_v45 = vld [vmem:[#allocation3 + $0xe0] sm:$0xff]  ;;  %v1026_v50 = vld [vmem:[#allocation3 + $0xf8] sm:$0xff]  ;;  %v1025_v55 = vld [vmem:[#allocation3 + $0xf0] sm:$0xff] }
 0x1d8   : > { %v1240_v61 = vld [vmem:[#allocation9] sm:$0xff]  ;;  %v1241_v7 = vld [vmem:[#allocation9 + $0x8] sm:$0xff]  ;;  %v1242_v59 = vld [vmem:[#allocation9 + $0x10] sm:$0xff] }
 0x1d9   : > { %v1256_v0 = vld [vmem:[#allocation9 + $0x80] sm:$0xff]  ;;  %v1257_v16 = vld [vmem:[#allocation9 + $0x88] sm:$0xff] }
 0x1da   : > { %1705 = vmatpush3.bf16.msra.mxu0 %v1032_v1  ;;  %1836 = vmatpush3.bf16.msra.mxu1 %v1032_v1  ;;  %v1258_v1 = vld [vmem:[#allocation9 + $0x90] sm:$0xff] }
 0x1db   : > { %1706 = vmatprep.subr.bf16.mxu0 %v1041_v18  ;;  %1829 = vmatprep.subr.bf16.mxu1 %v1041_v18 }
 0x1de   : > { %1707 = vmatpush3.bf16.msra.mxu0 %v1033_v20  ;;  %1837 = vmatpush3.bf16.msra.mxu1 %v1033_v20 }
 0x1df   : > { %1708 = vmatprep.subr.bf16.mxu0 %v1042_v25  ;;  %1830 = vmatprep.subr.bf16.mxu1 %v1042_v25 }
 0x1e2   : > { %1709 = vmatpush3.bf16.msra.mxu0 %v1034_v27  ;;  %1838 = vmatpush3.bf16.msra.mxu1 %v1034_v27 }
 0x1e3   : > { %1710 = vmatprep.subr.bf16.mxu0 %v1043_v46  ;;  %1831 = vmatprep.subr.bf16.mxu1 %v1043_v46 }
 0x1e6   : > { %1711 = vmatpush3.bf16.msra.mxu0 %v1035_v47  ;;  %1839 = vmatpush3.bf16.msra.mxu1 %v1035_v47  ;;  %v1243_v47 = vld [vmem:[#allocation9 + $0x18] sm:$0xff] }
 0x1e9   : > { %1077 = vmatmul.mubr.bf16.vlgmr.msra.gmra.mrb[0].mxu0 %v995_v51  ;;  %1141 = vmatmul.mubr.bf16.vlgmr.msra.gmra.mrb[0].mxu1 %v1011_v53  ;;  %v1259_v53 = vld [vmem:[#allocation9 + $0x98] sm:$0xff] }
 0x1ea   : > { %1084 = vmatprep.mubr.bf16.mxu0 %v998_v8  ;;  %1148 = vmatprep.mubr.bf16.mxu1 %v1014_v9 }
 0x1f1   : > { %1085 = vmatmul.mubr.bf16.gmra.mrb[4].mxu0 %v997_v13  ;;  %1149 = vmatmul.mubr.bf16.gmra.mrb[4].mxu1 %v1013_v17 }
 0x1f2   : > { %1092 = vmatprep.mubr.bf16.mxu0 %v1000_v40  ;;  %1156 = vmatprep.mubr.bf16.mxu1 %v1016_v42 }
 0x1f9   : > { %1093 = vmatmul.mubr.bf16.gmra.mrb[8].mxu0 %v999_v49  ;;  %1157 = vmatmul.mubr.bf16.gmra.mrb[8].mxu1 %v1015_v52 }
 0x1fa   : > { %1100 = vmatprep.mubr.bf16.mxu0 %v1002_v10  ;;  %1164 = vmatprep.mubr.bf16.mxu1 %v1018_v11 }
 0x201   : > { %1101 = vmatmul.mubr.bf16.gmra.mrb[12].mxu0 %v1001_v23  ;;  %1165 = vmatmul.mubr.bf16.gmra.mrb[12].mxu1 %v1017_v26  ;;  %v1244_v26 = vld [vmem:[#allocation9 + $0x20] sm:$0xff] }
 0x202   : > { %1108 = vmatprep.mubr.bf16.mxu0 %v1004_v28  ;;  %1172 = vmatprep.mubr.bf16.mxu1 %v1020_v29  ;;  %v1260_v29 = vld [vmem:[#allocation9 + $0xa0] sm:$0xff] }
 0x209   : > { %1109 = vmatmul.mubr.bf16.gmra.mrb[16].mxu0 %v1003_v30  ;;  %1173 = vmatmul.mubr.bf16.gmra.mrb[16].mxu1 %v1019_v31 }
 0x20a   : > { %1116 = vmatprep.mubr.bf16.mxu0 %v1006_v32  ;;  %1180 = vmatprep.mubr.bf16.mxu1 %v1022_v33 }
 0x211   : > { %1117 = vmatmul.mubr.bf16.gmra.mrb[20].mxu0 %v1005_v34  ;;  %1181 = vmatmul.mubr.bf16.gmra.mrb[20].mxu1 %v1021_v35  ;;  %v1245_v35 = vld [vmem:[#allocation9 + $0x28] sm:$0xff] }
 0x212   : > { %1124 = vmatprep.mubr.bf16.mxu0 %v1008_v38  ;;  %1188 = vmatprep.mubr.bf16.mxu1 %v1024_v39  ;;  %v1261_v39 = vld [vmem:[#allocation9 + $0xa8] sm:$0xff] }
 0x219   : > { %1125 = vmatmul.mubr.bf16.gmra.mrb[24].mxu0 %v1007_v44  ;;  %1189 = vmatmul.mubr.bf16.gmra.mrb[24].mxu1 %v1023_v45 }
 0x21a   : > { %1132 = vmatprep.mubr.bf16.mxu0 %v1010_v48  ;;  %1196 = vmatprep.mubr.bf16.mxu1 %v1026_v50 }
 0x221   : > { %1133 = vmatmul.mubr.bf16.gmra.mrb[28].mxu0 %v1009_v54  ;;  %1197 = vmatmul.mubr.bf16.gmra.mrb[28].mxu1 %v1025_v55 }
 0x2bc   : > { %v1712_v56 = vpop.f32.mrb[0].mxu0  ;;  %v1760_v57 = vpop.f32.mrb[0].mxu1 }
 0x2bd   : > { %v1713_v60 = vpop.f32.mrb[1].mxu0  ;;  %v1761_v62 = vpop.f32.mrb[1].mxu1 }
 0x2be   : > { %v1714_v2 = vadd.f32 %v1713_v60, %v1712_v56  ;;  %v1762_v3 = vadd.f32 %v1761_v62, %v1760_v57  ;;  %v1715_v4 = vpop.f32.mrb[2].mxu0  ;;  %v1763_v5 = vpop.f32.mrb[2].mxu1 }
 0x2bf   : > { %v1716_v6 = vpop.f32.mrb[3].mxu0  ;;  %v1764_v12 = vpop.f32.mrb[3].mxu1 }
 0x2c0   : > { %v2309_v22 = vadd.f32 %v1714_v2, %v1240_v61  ;;  %v2311_v24 = vadd.f32 %v1762_v3, %v1256_v0  ;;  %v1717_v14 = vadd.f32 %v1716_v6, %v1715_v4  ;;  %v1765_v15 = vadd.f32 %v1764_v12, %v1763_v5  ;;  %v1246_v0 = vld [vmem:[#allocation9 + $0x30] sm:$0xff] }
 0x2c2   : > { %v1205_v19 = vpack.c.bf16 %v1717_v14, %v1714_v2  ;;  %v2313_v21 = vadd.f32 %v1717_v14, %v1241_v7  ;;  %v1213_v36 = vpack.c.bf16 %v1765_v15, %v1762_v3  ;;  %v2315_v37 = vadd.f32 %v1765_v15, %v1257_v16  ;;  %v1262_v3 = vld [vmem:[#allocation9 + $0xb0] sm:$0xff]  ;;  %v1247_v16 = vld [vmem:[#allocation9 + $0x38] sm:$0xff] }
 0x2c3   : > { %v1263_v15 = vld [vmem:[#allocation9 + $0xb8] sm:$0xff] }
 0x2c4   : > { %1223 = vst [vmem:[#allocation2] sm:$0xff] %v1205_v19  ;;  %1231 = vst [vmem:[#allocation2 + $0x40] sm:$0xff] %v1213_v36  ;;  %v1718_v41 = vpop.f32.mrb[4].mxu0  ;;  %v1766_v43 = vpop.f32.mrb[4].mxu1 }
 0x2c5   : > { %v1719_v58 = vpop.f32.mrb[5].mxu0  ;;  %v1767_v63 = vpop.f32.mrb[5].mxu1 }
 0x2c6   : > { %v1720_v18 = vadd.f32 %v1719_v58, %v1718_v41  ;;  %v1768_v20 = vadd.f32 %v1767_v63, %v1766_v43  ;;  %v1721_v25 = vpop.f32.mrb[6].mxu0  ;;  %v1769_v27 = vpop.f32.mrb[6].mxu1 }
 0x2c7   : > { %v1722_v46 = vpop.f32.mrb[7].mxu0  ;;  %v1770_v51 = vpop.f32.mrb[7].mxu1 }
 0x2c8   : > { %v2317_v8 = vadd.f32 %v1720_v18, %v1242_v59  ;;  %v2319_v9 = vadd.f32 %v1768_v20, %v1258_v1  ;;  %v1723_v13 = vadd.f32 %v1722_v46, %v1721_v25  ;;  %v1771_v17 = vadd.f32 %v1770_v51, %v1769_v27  ;;  %v1248_v27 = vld [vmem:[#allocation9 + $0x40] sm:$0xff] }
 0x2ca   : > { %v1206_v40 = vpack.c.bf16 %v1723_v13, %v1720_v18  ;;  %v2321_v42 = vadd.f32 %v1723_v13, %v1243_v47  ;;  %v1214_v49 = vpack.c.bf16 %v1771_v17, %v1768_v20  ;;  %v2323_v52 = vadd.f32 %v1771_v17, %v1259_v53  ;;  %v1264_v47 = vld [vmem:[#allocation9 + $0xc0] sm:$0xff] }
 0x2cc   : > { %1224 = vst [vmem:[#allocation2 + $0x8] sm:$0xff] %v1206_v40  ;;  %1232 = vst [vmem:[#allocation2 + $0x48] sm:$0xff] %v1214_v49  ;;  %v1724_v10 = vpop.f32.mrb[8].mxu0  ;;  %v1772_v11 = vpop.f32.mrb[8].mxu1  ;;  %v1249_v49 = vld [vmem:[#allocation9 + $0x48] sm:$0xff] }
 0x2cd   : > { %v1725_v23 = vpop.f32.mrb[9].mxu0  ;;  %v1773_v28 = vpop.f32.mrb[9].mxu1 }
 0x2ce   : > { %v1726_v30 = vadd.f32 %v1725_v23, %v1724_v10  ;;  %v1774_v31 = vadd.f32 %v1773_v28, %v1772_v11  ;;  %v1727_v32 = vpop.f32.mrb[10].mxu0  ;;  %v1775_v33 = vpop.f32.mrb[10].mxu1  ;;  %v1265_v11 = vld [vmem:[#allocation9 + $0xc8] sm:$0xff] }
 0x2cf   : > { %v1728_v34 = vpop.f32.mrb[11].mxu0  ;;  %v1776_v38 = vpop.f32.mrb[11].mxu1 }
 0x2d0   : > { %v2325_v44 = vadd.f32 %v1726_v30, %v1244_v26  ;;  %v2327_v45 = vadd.f32 %v1774_v31, %v1260_v29  ;;  %v1729_v48 = vadd.f32 %v1728_v34, %v1727_v32  ;;  %v1777_v50 = vadd.f32 %v1776_v38, %v1775_v33 }
 0x2d2   : > { %v1207_v54 = vpack.c.bf16 %v1729_v48, %v1726_v30  ;;  %v2329_v55 = vadd.f32 %v1729_v48, %v1245_v35  ;;  %v1215_v56 = vpack.c.bf16 %v1777_v50, %v1774_v31  ;;  %v2331_v57 = vadd.f32 %v1777_v50, %v1261_v39  ;;  %v1250_v39 = vld [vmem:[#allocation9 + $0x50] sm:$0xff] }
 0x2d3   : > { %v1266_v50 = vld [vmem:[#allocation9 + $0xd0] sm:$0xff] }
 0x2d4   : > { %1225 = vst [vmem:[#allocation2 + $0x10] sm:$0xff] %v1207_v54  ;;  %1233 = vst [vmem:[#allocation2 + $0x50] sm:$0xff] %v1215_v56  ;;  %v1730_v60 = vpop.f32.mrb[12].mxu0  ;;  %v1778_v61 = vpop.f32.mrb[12].mxu1 }
 0x2d5   : > { %v1731_v62 = vpop.f32.mrb[13].mxu0  ;;  %v1779_v2 = vpop.f32.mrb[13].mxu1 }
 0x2d6   : > { %v1732_v4 = vadd.f32 %v1731_v62, %v1730_v60  ;;  %v1780_v5 = vadd.f32 %v1779_v2, %v1778_v61  ;;  %v1733_v6 = vpop.f32.mrb[14].mxu0  ;;  %v1781_v7 = vpop.f32.mrb[14].mxu1 }
 0x2d7   : > { %v1734_v12 = vpop.f32.mrb[15].mxu0  ;;  %v1782_v14 = vpop.f32.mrb[15].mxu1 }
 0x2d8   : > { %v2333_v19 = vadd.f32 %v1732_v4, %v1246_v0  ;;  %v2335_v36 = vadd.f32 %v1780_v5, %v1262_v3  ;;  %v1735_v41 = vadd.f32 %v1734_v12, %v1733_v6  ;;  %v1783_v43 = vadd.f32 %v1782_v14, %v1781_v7  ;;  %v1251_v0 = vld [vmem:[#allocation9 + $0x58] sm:$0xff] }
 0x2d9   : > { %v1267_v3 = vld [vmem:[#allocation9 + $0xd8] sm:$0xff] }
 0x2da   : > { %v1208_v58 = vpack.c.bf16 %v1735_v41, %v1732_v4  ;;  %v2337_v59 = vadd.f32 %v1735_v41, %v1247_v16  ;;  %v1216_v63 = vpack.c.bf16 %v1783_v43, %v1780_v5  ;;  %v2339_v1 = vadd.f32 %v1783_v43, %v1263_v15 }
 0x2dc   : > { %1226 = vst [vmem:[#allocation2 + $0x18] sm:$0xff] %v1208_v58  ;;  %1234 = vst [vmem:[#allocation2 + $0x58] sm:$0xff] %v1216_v63  ;;  %v1736_v18 = vpop.f32.mrb[16].mxu0  ;;  %v1784_v20 = vpop.f32.mrb[16].mxu1  ;;  %v1252_v63 = vld [vmem:[#allocation9 + $0x60] sm:$0xff] }
 0x2dd   : > { %v1737_v25 = vpop.f32.mrb[17].mxu0  ;;  %v1785_v46 = vpop.f32.mrb[17].mxu1 }
 0x2de   : > { %v1738_v51 = vadd.f32 %v1737_v25, %v1736_v18  ;;  %v1786_v53 = vadd.f32 %v1785_v46, %v1784_v20  ;;  %v1739_v13 = vpop.f32.mrb[18].mxu0  ;;  %v1787_v17 = vpop.f32.mrb[18].mxu1  ;;  %v1268_v20 = vld [vmem:[#allocation9 + $0xe0] sm:$0xff] }
 0x2df   : > { %v1740_v40 = vpop.f32.mrb[19].mxu0  ;;  %v1788_v10 = vpop.f32.mrb[19].mxu1 }
 0x2e0   : > { %v2341_v23 = vadd.f32 %v1738_v51, %v1248_v27  ;;  %v2343_v26 = vadd.f32 %v1786_v53, %v1264_v47  ;;  %v1741_v28 = vadd.f32 %v1740_v40, %v1739_v13  ;;  %v1789_v29 = vadd.f32 %v1788_v10, %v1787_v17  ;;  %v1269_v17 = vld [vmem:[#allocation9 + $0xe8] sm:$0xff] }
 0x2e2   : > { %v1209_v30 = vpack.c.bf16 %v1741_v28, %v1738_v51  ;;  %v2345_v31 = vadd.f32 %v1741_v28, %v1249_v49  ;;  %v1217_v32 = vpack.c.bf16 %v1789_v29, %v1786_v53  ;;  %v2347_v33 = vadd.f32 %v1789_v29, %v1265_v11  ;;  %v1253_v53 = vld [vmem:[#allocation9 + $0x68] sm:$0xff] }
 0x2e4   : > { %1227 = vst [vmem:[#allocation2 + $0x20] sm:$0xff] %v1209_v30  ;;  %1235 = vst [vmem:[#allocation2 + $0x60] sm:$0xff] %v1217_v32  ;;  %v1742_v34 = vpop.f32.mrb[20].mxu0  ;;  %v1790_v35 = vpop.f32.mrb[20].mxu1 }
 0x2e5   : > { %v1743_v38 = vpop.f32.mrb[21].mxu0  ;;  %v1791_v48 = vpop.f32.mrb[21].mxu1 }
 0x2e6   : > { %v1744_v54 = vadd.f32 %v1743_v38, %v1742_v34  ;;  %v1792_v56 = vadd.f32 %v1791_v48, %v1790_v35  ;;  %v1745_v60 = vpop.f32.mrb[22].mxu0  ;;  %v1793_v61 = vpop.f32.mrb[22].mxu1 }
 0x2e7   : > { %v1746_v62 = vpop.f32.mrb[23].mxu0  ;;  %v1794_v2 = vpop.f32.mrb[23].mxu1 }
 0x2e8   : > { %v2349_v4 = vadd.f32 %v1744_v54, %v1250_v39  ;;  %v2351_v5 = vadd.f32 %v1792_v56, %v1266_v50  ;;  %v1747_v6 = vadd.f32 %v1746_v62, %v1745_v60  ;;  %v1795_v7 = vadd.f32 %v1794_v2, %v1793_v61  ;;  %v1254_v39 = vld [vmem:[#allocation9 + $0x70] sm:$0xff] }
 0x2e9   : > { %v1270_v50 = vld [vmem:[#allocation9 + $0xf0] sm:$0xff] }
 0x2ea   : > { %v1210_v12 = vpack.c.bf16 %v1747_v6, %v1744_v54  ;;  %v2353_v16 = vadd.f32 %v1747_v6, %v1251_v0  ;;  %v1218_v14 = vpack.c.bf16 %v1795_v7, %v1792_v56  ;;  %v2355_v15 = vadd.f32 %v1795_v7, %v1267_v3  ;;  %v1255_v0 = vld [vmem:[#allocation9 + $0x78] sm:$0xff] }
 0x2eb   : > { %v1271_v3 = vld [vmem:[#allocation9 + $0xf8] sm:$0xff] }
 0x2ec   : > { %1228 = vst [vmem:[#allocation2 + $0x28] sm:$0xff] %v1210_v12  ;;  %1236 = vst [vmem:[#allocation2 + $0x68] sm:$0xff] %v1218_v14  ;;  %v1748_v41 = vpop.f32.mrb[24].mxu0  ;;  %v1796_v43 = vpop.f32.mrb[24].mxu1 }
 0x2ed   : > { %v1749_v58 = vpop.f32.mrb[25].mxu0  ;;  %v1797_v18 = vpop.f32.mrb[25].mxu1 }
 0x2ee   : > { %v1750_v25 = vadd.f32 %v1749_v58, %v1748_v41  ;;  %v1798_v27 = vadd.f32 %v1797_v18, %v1796_v43  ;;  %v1751_v46 = vpop.f32.mrb[26].mxu0  ;;  %v1799_v47 = vpop.f32.mrb[26].mxu1  ;;  %v1308_v18 = vmul.f32 (!%p1578_p2), 0.25, %v2309_v22 }
 0x2ef   : > { %v1752_v51 = vpop.f32.mrb[27].mxu0  ;;  %v1800_v13 = vpop.f32.mrb[27].mxu1 }
 0x2f0   : > { %v2357_v40 = vadd.f32 %v1750_v25, %v1252_v63  ;;  %v2359_v49 = vadd.f32 %v1798_v27, %v1268_v20  ;;  %v1753_v10 = vadd.f32 %v1752_v51, %v1751_v46  ;;  %v1801_v11 = vadd.f32 %v1800_v13, %v1799_v47  ;;  %1340 = vst [vmem:[#allocation9] sm:$0xff] (!%p1578_p2), %v1308_v18 }
 0x2f1   : > { %v1309_v20 = vmul.f32 (!%p1578_p2), 0.25, %v2313_v21  ;;  %v1312_v46 = vmul.f32 (!%p1578_p2), 0.25, %v2325_v44  ;;  %v1313_v47 = vmul.f32 (!%p1578_p2), 0.25, %v2329_v55  ;;  %v1314_v51 = vmul.f32 (!%p1578_p2), 0.25, %v2333_v19 }
 0x2f2   : > { %v1211_v28 = vpack.c.bf16 %v1753_v10, %v1750_v25  ;;  %v2361_v29 = vadd.f32 %v1753_v10, %v1253_v53  ;;  %v1219_v30 = vpack.c.bf16 %v1801_v11, %v1798_v27  ;;  %v2363_v32 = vadd.f32 %v1801_v11, %v1269_v17 }
 0x2f3   : > { %v1310_v25 = vmul.f32 (!%p1578_p2), 0.25, %v2317_v8  ;;  %v1311_v27 = vmul.f32 (!%p1578_p2), 0.25, %v2321_v42  ;;  %v1315_v53 = vmul.f32 (!%p1578_p2), 0.25, %v2337_v59  ;;  %1341 = vst [vmem:[#allocation9 + $0x8] sm:$0xff] (!%p1578_p2), %v1309_v20  ;;  %v1316_v13 = vmul.f32 (!%p1578_p2), 0.25, %v2341_v23  ;;  %1344 = vst [vmem:[#allocation9 + $0x20] sm:$0xff] (!%p1578_p2), %v1312_v46 }
 0x2f4   : > { %1229 = vst [vmem:[#allocation2 + $0x30] sm:$0xff] %v1211_v28  ;;  %1237 = vst [vmem:[#allocation2 + $0x70] sm:$0xff] %v1219_v30  ;;  %v1754_v34 = vpop.f32.mrb[28].mxu0  ;;  %v1802_v35 = vpop.f32.mrb[28].mxu1  ;;  %v1317_v17 = vmul.f32 (!%p1578_p2), 0.25, %v2345_v31  ;;  %v1318_v10 = vmul.f32 (!%p1578_p2), 0.25, %v2349_v4 }
 0x2f5   : > { %v1755_v38 = vpop.f32.mrb[29].mxu0  ;;  %v1803_v48 = vpop.f32.mrb[29].mxu1  ;;  %1342 = vst [vmem:[#allocation9 + $0x10] sm:$0xff] (!%p1578_p2), %v1310_v25  ;;  %1343 = vst [vmem:[#allocation9 + $0x18] sm:$0xff] (!%p1578_p2), %v1311_v27  ;;  %v1319_v11 = vmul.f32 (!%p1578_p2), 0.25, %v2353_v16  ;;  %v1320_v28 = vmul.f32 (!%p1578_p2), 0.25, %v2357_v40 }
 0x2f6   : > { %v1756_v54 = vadd.f32 %v1755_v38, %v1754_v34  ;;  %v1804_v56 = vadd.f32 %v1803_v48, %v1802_v35  ;;  %v1757_v60 = vpop.f32.mrb[30].mxu0  ;;  %v1805_v61 = vpop.f32.mrb[30].mxu1  ;;  %1307 = sbr.rel (%p1578_p2) target bundleno = 774 (0x306), region = 60  ;;  %1345 = vst [vmem:[#allocation9 + $0x28] sm:$0xff] (!%p1578_p2), %v1313_v47  ;;  %1346 = vst [vmem:[#allocation9 + $0x30] sm:$0xff] (!%p1578_p2), %v1314_v51  ;;  %v1321_v30 = vmul.f32 (!%p1578_p2), 0.25, %v2361_v29 }
 0x2f7   : > { %v1758_v62 = vpop.f32.mrb[31].mxu0  ;;  %v1806_v2 = vpop.f32.mrb[31].mxu1  ;;  %1347 = vst [vmem:[#allocation9 + $0x38] sm:$0xff] (!%p1578_p2), %v1315_v53  ;;  %1348 = vst [vmem:[#allocation9 + $0x40] sm:$0xff] (!%p1578_p2), %v1316_v13  ;;  %v1324_v38 = vmul.f32 (!%p1578_p2), 0.25, %v2311_v24  ;;  %v1326_v48 = vmul.f32 (!%p1578_p2), 0.25, %v2319_v9 }
 0x2f8   : > { %v2365_v6 = vadd.f32 %v1756_v54, %v1254_v39  ;;  %v2367_v7 = vadd.f32 %v1804_v56, %v1270_v50  ;;  %v1759_v12 = vadd.f32 %v1758_v62, %v1757_v60  ;;  %v1807_v14 = vadd.f32 %v1806_v2, %v1805_v61  ;;  %1349 = vst [vmem:[#allocation9 + $0x48] sm:$0xff] (!%p1578_p2), %v1317_v17 }
 0x2f9   : > { %1350 = vst [vmem:[#allocation9 + $0x50] sm:$0xff] (!%p1578_p2), %v1318_v10  ;;  %1351 = vst [vmem:[#allocation9 + $0x58] sm:$0xff] (!%p1578_p2), %v1319_v11  ;;  %v1325_v39 = vmul.f32 (!%p1578_p2), 0.25, %v2315_v37  ;;  %v1327_v50 = vmul.f32 (!%p1578_p2), 0.25, %v2323_v52  ;;  %v1330_v60 = vmul.f32 (!%p1578_p2), 0.25, %v2335_v36  ;;  %v1331_v61 = vmul.f32 (!%p1578_p2), 0.25, %v2339_v1 }
 0x2fa   : > { %v1212_v41 = vpack.c.bf16 %v1759_v12, %v1756_v54  ;;  %v2369_v43 = vadd.f32 %v1759_v12, %v1255_v0  ;;  %v1220_v58 = vpack.c.bf16 %v1807_v14, %v1804_v56  ;;  %v2371_v63 = vadd.f32 %v1807_v14, %v1271_v3  ;;  %1352 = vst [vmem:[#allocation9 + $0x60] sm:$0xff] (!%p1578_p2), %v1320_v28 }
 0x2fb   : > { %v1322_v34 = vmul.f32 (!%p1578_p2), 0.25, %v2365_v6  ;;  %1353 = vst [vmem:[#allocation9 + $0x68] sm:$0xff] (!%p1578_p2), %v1321_v30  ;;  %v1328_v54 = vmul.f32 (!%p1578_p2), 0.25, %v2327_v45  ;;  %v1329_v56 = vmul.f32 (!%p1578_p2), 0.25, %v2331_v57  ;;  %1356 = vst [vmem:[#allocation9 + $0x80] sm:$0xff] (!%p1578_p2), %v1324_v38  ;;  %v1332_v62 = vmul.f32 (!%p1578_p2), 0.25, %v2343_v26 }
 0x2fc   : > { %1230 = vst [vmem:[#allocation2 + $0x38] sm:$0xff] %v1212_v41  ;;  %1238 = vst [vmem:[#allocation2 + $0x78] sm:$0xff] %v1220_v58  ;;  %v1323_v35 = vmul.f32 (!%p1578_p2), 0.25, %v2369_v43  ;;  %v1333_v0 = vmul.f32 (!%p1578_p2), 0.25, %v2347_v33  ;;  %v1334_v2 = vmul.f32 (!%p1578_p2), 0.25, %v2351_v5  ;;  %v1335_v3 = vmul.f32 (!%p1578_p2), 0.25, %v2355_v15 }
 0x2fd   : > { %1354 = vst [vmem:[#allocation9 + $0x70] sm:$0xff] %v1322_v34  ;;  %1357 = vst [vmem:[#allocation9 + $0x88] sm:$0xff] %v1325_v39  ;;  %v1336_v12 = vmul.f32 0.25, %v2359_v49  ;;  %v1337_v14 = vmul.f32 0.25, %v2363_v32  ;;  %v1338_v41 = vmul.f32 0.25, %v2367_v7  ;;  %v1339_v58 = vmul.f32 0.25, %v2371_v63 }
 0x2fe   : > { %1355 = vst [vmem:[#allocation9 + $0x78] sm:$0xff] %v1323_v35  ;;  %1358 = vst [vmem:[#allocation9 + $0x90] sm:$0xff] %v1326_v48 }
 0x2ff   : > { %1359 = vst [vmem:[#allocation9 + $0x98] sm:$0xff] %v1327_v50  ;;  %1360 = vst [vmem:[#allocation9 + $0xa0] sm:$0xff] %v1328_v54 }
 0x300   : > { %1361 = vst [vmem:[#allocation9 + $0xa8] sm:$0xff] %v1329_v56  ;;  %1362 = vst [vmem:[#allocation9 + $0xb0] sm:$0xff] %v1330_v60 }
 0x301   : > { %1363 = vst [vmem:[#allocation9 + $0xb8] sm:$0xff] %v1331_v61  ;;  %1364 = vst [vmem:[#allocation9 + $0xc0] sm:$0xff] %v1332_v62 }
 0x302   : > { %1365 = vst [vmem:[#allocation9 + $0xc8] sm:$0xff] %v1333_v0  ;;  %1366 = vst [vmem:[#allocation9 + $0xd0] sm:$0xff] %v1334_v2 }
 0x303   : > { %1367 = vst [vmem:[#allocation9 + $0xd8] sm:$0xff] %v1335_v3  ;;  %1368 = vst [vmem:[#allocation9 + $0xe0] sm:$0xff] %v1336_v12 }
 0x304   : > { %1369 = vst [vmem:[#allocation9 + $0xe8] sm:$0xff] %v1337_v14  ;;  %1370 = vst [vmem:[#allocation9 + $0xf0] sm:$0xff] %v1338_v41 }
 0x305   : > { %1371 = vst [vmem:[#allocation9 + $0xf8] sm:$0xff] %v1339_v58 }
 0x306 PF: > { %p1579_p6 = scmp.ge.s32.totalorder %s2053_s9, 3 }
 0x307   : > { %1376 = vst [vmem:[#allocation9] sm:$0xff] (!%p1579_p6), %v2309_v22  ;;  %1377 = vst [vmem:[#allocation9 + $0x8] sm:$0xff] (!%p1579_p6), %v2313_v21 }
 0x308   : > { %1375 = sbr.rel (%p1579_p6) target bundleno = 791 (0x317), region = 64  ;;  %1378 = vst [vmem:[#allocation9 + $0x10] sm:$0xff] (!%p1579_p6), %v2317_v8  ;;  %1379 = vst [vmem:[#allocation9 + $0x18] sm:$0xff] (!%p1579_p6), %v2321_v42 }
 0x309   : > { %1380 = vst [vmem:[#allocation9 + $0x20] sm:$0xff] (!%p1579_p6), %v2325_v44  ;;  %1381 = vst [vmem:[#allocation9 + $0x28] sm:$0xff] (!%p1579_p6), %v2329_v55 }
 0x30a   : > { %1382 = vst [vmem:[#allocation9 + $0x30] sm:$0xff] (!%p1579_p6), %v2333_v19  ;;  %1383 = vst [vmem:[#allocation9 + $0x38] sm:$0xff] (!%p1579_p6), %v2337_v59 }
 0x30b   : > { %1384 = vst [vmem:[#allocation9 + $0x40] sm:$0xff] (!%p1579_p6), %v2341_v23  ;;  %1385 = vst [vmem:[#allocation9 + $0x48] sm:$0xff] (!%p1579_p6), %v2345_v31 }
 0x30c   : > { %1386 = vst [vmem:[#allocation9 + $0x50] sm:$0xff] (!%p1579_p6), %v2349_v4  ;;  %1387 = vst [vmem:[#allocation9 + $0x58] sm:$0xff] (!%p1579_p6), %v2353_v16 }
 0x30d   : > { %1388 = vst [vmem:[#allocation9 + $0x60] sm:$0xff] (!%p1579_p6), %v2357_v40  ;;  %1389 = vst [vmem:[#allocation9 + $0x68] sm:$0xff] (!%p1579_p6), %v2361_v29 }
 0x30e   : > { %1390 = vst [vmem:[#allocation9 + $0x70] sm:$0xff] (!%p1579_p6), %v2365_v6  ;;  %1391 = vst [vmem:[#allocation9 + $0x78] sm:$0xff] (!%p1579_p6), %v2369_v43 }
 0x30f   : > { %1392 = vst [vmem:[#allocation9 + $0x80] sm:$0xff] %v2311_v24  ;;  %1393 = vst [vmem:[#allocation9 + $0x88] sm:$0xff] %v2315_v37 }
 0x310   : > { %1394 = vst [vmem:[#allocation9 + $0x90] sm:$0xff] %v2319_v9  ;;  %1395 = vst [vmem:[#allocation9 + $0x98] sm:$0xff] %v2323_v52 }
 0x311   : > { %1396 = vst [vmem:[#allocation9 + $0xa0] sm:$0xff] %v2327_v45  ;;  %1397 = vst [vmem:[#allocation9 + $0xa8] sm:$0xff] %v2331_v57 }
 0x312   : > { %1398 = vst [vmem:[#allocation9 + $0xb0] sm:$0xff] %v2335_v36  ;;  %1399 = vst [vmem:[#allocation9 + $0xb8] sm:$0xff] %v2339_v1 }
 0x313   : > { %1400 = vst [vmem:[#allocation9 + $0xc0] sm:$0xff] %v2343_v26  ;;  %1401 = vst [vmem:[#allocation9 + $0xc8] sm:$0xff] %v2347_v33 }
 0x314   : > { %1402 = vst [vmem:[#allocation9 + $0xd0] sm:$0xff] %v2351_v5  ;;  %1403 = vst [vmem:[#allocation9 + $0xd8] sm:$0xff] %v2355_v15 }
 0x315   : > { %1404 = vst [vmem:[#allocation9 + $0xe0] sm:$0xff] %v2359_v49  ;;  %1405 = vst [vmem:[#allocation9 + $0xe8] sm:$0xff] %v2363_v32 }
 0x316   : > { %1406 = vst [vmem:[#allocation9 + $0xf0] sm:$0xff] %v2367_v7  ;;  %1407 = vst [vmem:[#allocation9 + $0xf8] sm:$0xff] %v2371_v63 }
 0x317 PF: > { %p2441_p8 = scmp.eq.s32.totalorder %s1518_s12, 3  ;;  %s2067_s25 = smov [#allocation9]  }
 0x318   : > { %s1414_s26 = sshll.u32 %s2067_s25, 4  ;;  %s1415_s26 = int_to_ptr.vmem [resolvable:$true] %s1414_s26 }
 0x319   : > { %s2001_s27 = scalar_lea.vmem %s1415_s26, 4096  ;;  %p2008_p3 = scmp.lt.s32.totalorder %s1415_s26, %s1415_s26 }
 0x31a   : > { %p2002_p4 = scmp.ne.s32.totalorder %s1415_s26, %s2001_s27  ;;  %p2009_p9 = scmp.lt.s32.totalorder %s2001_s27, %s2001_s27 }
 0x31c   : > { %p2003_p5 = pnand %p2002_p4, %p2441_p8  ;;  %p2010_p10 = por %p2009_p9, %p2008_p3 }
 0x31e   : > { %p2004_p7 = pneg %p2003_p5 }
 0x320   : > { %p2011_p11 = pnand %p2010_p10, %p2004_p7 }
 0x322   : > { %2014 = shalt.err (!%p2011_p11)
}
 0x323   : > { %s2015_s12 = scalar_lea.hbm %s2478_s2, 4096 }
 0x324   : > { %p2016_p12 = scmp.ne.s32.totalorder %s2478_s2, %s2015_s12  ;;  %p2021_p1 = scmp.lt.u32.totalorder %s2015_s12, %s2478_s2 }
 0x326   : > { %p2017_p13 = pnand %p2016_p12, %p2441_p8 }
 0x328   : > { %p2018_p0 = pneg %p2017_p13 }
 0x32a   : > { %p2023_p2 = pnand %p2021_p1, %p2018_p0 }
 0x32c   : > { %2026 = shalt.err (!%p2023_p2)
}
 0x32d   : > { %s2068_s6 = smov 128   ;;  %s2069_s7 = smov 8  }
 0x32e   : > { %1849 = dma.vmem_to_hbm [thread:$0]  (%p2441_p8), %s1415_s26, 4096, %s2478_s2, [#allocation6], %s2068_s6, %s2068_s6, %s2069_s7  }
 0x32f   : > { %2048 = dma.done.wait (%p2441_p8), [#allocation6], 4096  }
 0x330   : > { %2050 = vsyncadd (%p2441_p8), [#allocation6], 4294963200 }
 0x331 PF: > { %s19_s11 = sadd.s32 1, %s2061_s11   ;;  %s2485_s9 = smov %s2057_s10 }
 0x332   : > { %p16_p6 = scmp.ge.s32.totalorder %s19_s11, 6   ;;  %s2486_s10 = smov %s2488_s13 }
 0x334   :  { %18 = sbr.rel (!%p16_p6) target bundleno = 6 (0x6), region = 116 }
 0x33b   :  { %1430 = vsyncpa [#allocation5], 1 }
 0x33c   :  { %1432 = vsyncpa [#allocation5 + $0x1], 1 }
 0x33d   :  { %1433 = vsyncpa [#allocation8], 1 }
 0x33e   :  { %1435 = vsyncpa [#allocation8 + $0x1], 1 }
 0x33f   :  { %1436 = vsyncpa [#allocation6], 1 }
 0x340   :  { %1438 = vsyncpa [#allocation6 + $0x1], 1 }

</bundles_post_ra>
